<compile_context>
chip_gen: v7x
topology: tpu7x:2x2x1
jax: 0.10.0
libtpu: 0.0.40
codegen_flags: <defaults>
</compile_context>

<pallas_src>
import functools

import jax
import jax.numpy as jnp
from jax.experimental import pallas as pl
from jax.experimental.pallas import tpu as pltpu

LN_EPS = 1e-5
MASK_BIG = 1e30  # additive mask magnitude; matches -inf semantics when >=1 key unmasked


def _layernorm(x, gamma, beta):
    mu = jnp.mean(x, axis=-1, keepdims=True)
    var = jnp.mean((x - mu) ** 2, axis=-1, keepdims=True)
    return (x - mu) * jax.lax.rsqrt(var + LN_EPS) * gamma + beta


# ----------------------------- Pallas kernel --------------------------------

def transformer_block_kernel(
    x_ref, bias_ref,
    wqkv_ref, bqkv_ref,
    lna_g_ref, lna_b_ref, w1_ref, b1_ref,
    ln1_g_ref, ln1_b_ref,
    wa1_ref, ba1_ref, wa2_ref, ba2_ref,
    ln2_g_ref, ln2_b_ref,
    out_ref,
    *, heads, head_dim, embedding_dim, b_tile, seq_len):
    B, D, E, hd = b_tile, seq_len, embedding_dim, head_dim
    BH = B * heads
    mxu = jnp.bfloat16          # MXU input dtype (f32 accumulation everywhere)

    x3 = x_ref[...]                                   # (B, D, E) f32
    x2 = x3.reshape(B * D, E)                         # leading-dim merge (safe)
    bias = bias_ref[...]                              # (B, 1, D): 0 keep, -1e30 masked key

    # ---- fused QKV projection: one (B*D, E) @ (E, 3E) matmul, bf16 in / f32 acc ----
    # (1/sqrt(E) is already folded into the Wq / bq columns by the wrapper.)
    qkv = jnp.dot(x2.astype(mxu), wqkv_ref[...],
                  preferred_element_type=jnp.float32) + bqkv_ref[...]   # (B*D, 3E) f32
    qkv3 = qkv.reshape(B, D, 3 * E)                   # leading-dim split (safe)

    # Head axis via static lane slices + stack (no minor-dim reshape).
    def head_split(base):
        parts = [qkv3[:, :, base + h * hd: base + (h + 1) * hd] for h in range(heads)]
        return jnp.stack(parts, axis=1).reshape(BH, D, hd)   # (B*heads, D, hd)

    qh = head_split(0).astype(mxu)
    kh = head_split(E).astype(mxu)
    vh = head_split(2 * E).astype(mxu)

    # ---- attention batched over (B*heads): single einsum chain, no batch loop ----
    s = jnp.einsum('zqd,zkd->zqk', qh, kh,
                   preferred_element_type=jnp.float32)        # (BH, D, D) f32
    s4 = s.reshape(B, heads, D, D) + bias[:, :, None, :]      # additive key mask

    s_max = jnp.max(s4, axis=-1, keepdims=True)
    p = jnp.exp(s4 - s_max)
    denom = jnp.sum(p, axis=-1, keepdims=True)
    p = p * pl.reciprocal(denom, approx=True)                 # EUP slot, ~free

    o = jnp.einsum('zqk,zkd->zqd',
                   p.reshape(BH, D, D).astype(mxu), vh,
                   preferred_element_type=jnp.float32)        # (BH, D, hd)
    o4 = o.reshape(B, heads, D, hd)                           # leading split (safe)

    # Merge heads back onto the embedding axis with a lane concat (no minor reshape).
    att = jnp.concatenate([o4[:, h] for h in range(heads)], axis=-1)   # (B, D, E)
    att = att.reshape(B * D, E)

    # ---- attention LayerNorm + output projection on flat rows ----
    att = _layernorm(att, lna_g_ref[...], lna_b_ref[...])
    att = jnp.dot(att.astype(mxu), w1_ref[...],
                  preferred_element_type=jnp.float32) + b1_ref[...]

    # ---- residual + LN1 + FFN + residual + LN2 (dropout == identity at eval) ----
    x1 = _layernorm(att + x2, ln1_g_ref[...], ln1_b_ref[...])
    h1 = jnp.dot(x1.astype(mxu), wa1_ref[...],
                 preferred_element_type=jnp.float32) + ba1_ref[...]
    h1 = jnp.maximum(h1, 0.0)
    ff = jnp.dot(h1.astype(mxu), wa2_ref[...],
                 preferred_element_type=jnp.float32) + ba2_ref[...]
    y = _layernorm(ff + x1, ln2_g_ref[...], ln2_b_ref[...])

    out_ref[...] = y.reshape(B, D, E)                         # leading split (safe)


# ------------------------------- wrapper -------------------------------------

def _pick_b_tile(n, d, row_target=512, min_rows=256):
    """Largest divisor of n with b_tile*d <= row_target; prefer >=2 grid steps
    (v7x megacore) when a smaller divisor still gives >= min_rows rows/step."""
    divs = [bt for bt in range(1, n + 1) if n % bt == 0]
    fitting = [bt for bt in divs if bt * d <= row_target] or [1]
    best = max(fitting)
    if best == n and n > 1:
        smaller = [bt for bt in divs if bt < n and bt * d >= min_rows]
        if smaller:
            best = max(smaller)
    return best


def transformer_block(x, mask_bias, lp, *, heads):
    N, D, E = x.shape
    hd = E // heads
    H = lp["wa1"].shape[1]
    b_tile = _pick_b_tile(N, D)
    grid = (N // b_tile,)

    mxu_dt = jnp.bfloat16
    inv_scale = 1.0 / (float(E) ** 0.5)
    # Fold 1/sqrt(E) into Wq/bq; fuse Q|K|V into one (E, 3E) weight; bf16 MXU weights.
    wqkv = jnp.concatenate([lp["wq"] * inv_scale, lp["wk"], lp["wv"]],
                           axis=1).astype(mxu_dt)                 # (E, 3E)
    bqkv = jnp.concatenate([lp["bq"] * inv_scale, lp["bk"], lp["bv"]], axis=1)  # (1,3E) f32
    w1 = lp["w1"].astype(mxu_dt)
    wa1 = lp["wa1"].astype(mxu_dt)
    wa2 = lp["wa2"].astype(mxu_dt)

    kern = functools.partial(
        transformer_block_kernel, heads=heads, head_dim=hd,
        embedding_dim=E, b_tile=b_tile, seq_len=D)

    def full(shape):
        nd = len(shape)
        return pl.BlockSpec(shape, lambda n, _nd=nd: (0,) * _nd)  # grid-invariant

    in_specs = [
        pl.BlockSpec((b_tile, D, E), lambda n: (n, 0, 0)),        # x
        pl.BlockSpec((b_tile, 1, D), lambda n: (n, 0, 0)),        # additive key-mask bias
        full((E, 3 * E)), full((1, 3 * E)),                       # fused Wqkv (bf16), bqkv
        full((1, E)), full((1, E)),                               # attention LN gamma/beta
        full((E, E)), full((1, E)),                               # linear1 W (bf16), b
        full((1, E)), full((1, E)),                               # LN1 gamma/beta
        full((E, H)), full((1, H)),                               # FFN up (bf16)
        full((H, E)), full((1, E)),                               # FFN down (bf16)
        full((1, E)), full((1, E)),                               # LN2 gamma/beta
    ]

    # Advisory cost estimate (lets XLA overlap surrounding ops with the kernel).
    flops = int(2 * N * D * (4 * E * E + 2 * E * H) + 4 * N * heads * D * D * hd)
    transcendentals = int(N * heads * D * D + 6 * N * D)
    bytes_accessed = int(4 * (2 * N * D * E + N * D)
                         + 2 * (4 * E * E + 2 * E * H)
                         + 4 * (11 * E + H))

    # VMEM budget: bf16 weights + double-buffered activation blocks + intermediates.
    weight_bytes = 2 * (4 * E * E + 2 * E * H) + 4 * (11 * E + H)
    block_bytes = 4 * (2 * b_tile * D * E + b_tile * D)
    work_bytes = 4 * b_tile * D * (4 * E + 2 * H + 2 * heads * D)
    est_vmem = 2 * weight_bytes + 2 * block_bytes + work_bytes

    try:  # derive the cap per generation; keep 25% headroom (v7x: <=48 MiB of 64 MiB)
        phys_vmem = int(getattr(pltpu.get_tpu_info(), "vmem_capacity_bytes",
                                128 * 1024 * 1024))
    except Exception:
        phys_vmem = 128 * 1024 * 1024
    vmem_cap = int(0.75 * phys_vmem)
    vmem_limit = int(min(vmem_cap, max(32 * 1024 * 1024, 2 * est_vmem)))

    return pl.pallas_call(
        kern,
        out_shape=jax.ShapeDtypeStruct((N, D, E), jnp.float32),
        grid=grid,
        in_specs=in_specs,
        out_specs=pl.BlockSpec((b_tile, D, E), lambda n: (n, 0, 0)),
        compiler_params=pltpu.CompilerParams(
            dimension_semantics=("parallel",),
            vmem_limit_bytes=vmem_limit),
        cost_estimate=pl.CostEstimate(
            flops=flops, transcendentals=transcendentals,
            bytes_accessed=bytes_accessed),
    )(x, mask_bias,
      wqkv, bqkv,
      lp["lna_g"], lp["lna_b"], w1, lp["b1"],
      lp["ln1_g"], lp["ln1_b"],
      wa1, lp["ba1"], wa2, lp["ba2"],
      lp["ln2_g"], lp["ln2_b"])


def encoder_forward(params, tok_idx, pad_mask, *, heads):
    N, D = tok_idx.shape
    tok = params["tok_emb"][tok_idx]                 # (N, D, E) gather (JAX glue)
    pos = params["pos_emb"][jnp.arange(D)]           # (D, E)
    x = (tok + pos[None, :, :]).astype(jnp.float32)  # dropout == identity (eval)
    # Additive key-mask bias precomputed once: 0 where keep, -1e30 where pad.
    mask_bias = (pad_mask.astype(jnp.float32) - 1.0) * MASK_BIG   # (N, 1, D)
    for lp in params["layers"]:
        x = transformer_block(x, mask_bias, lp, heads=heads)
    return x


# ---------------- pure-JAX f32 reference (for correctness check) ----------------

def _ref_block(x, pad_mask, lp, heads):
    N, D, E = x.shape
    hd = E // heads
    q = x @ lp["wq"] + lp["bq"]
    k = x @ lp["wk"] + lp["bk"]
    v = x @ lp["wv"] + lp["bv"]
    qh = q.reshape(N, D, heads, hd)
    kh = k.reshape(N, D, heads, hd)
    vh = v.reshape(N, D, heads, hd)
    s = jnp.einsum("nqhd,nkhd->nhqk", qh, kh)
    s = jnp.where(pad_mask[:, None, :, :] == 0.0, -MASK_BIG, s)
    p = jax.nn.softmax(s / (E ** 0.5), axis=3)
    fa = jnp.einsum("nhql,nlhd->nqhd", p, vh).reshape(N, D, E)
    att = _layernorm(fa, lp["lna_g"], lp["lna_b"]) @ lp["w1"] + lp["b1"]
    x1 = _layernorm(att + x, lp["ln1_g"], lp["ln1_b"])
    ff = jnp.maximum(x1 @ lp["wa1"] + lp["ba1"], 0.0) @ lp["wa2"] + lp["ba2"]
    return _layernorm(ff + x1, lp["ln2_g"], lp["ln2_b"])


def ref_forward(params, tok_idx, pad_mask, *, heads):
    N, D = tok_idx.shape
    x = params["tok_emb"][tok_idx] + params["pos_emb"][jnp.arange(D)][None]
    for lp in params["layers"]:
        x = _ref_block(x, pad_mask, lp, heads)
    return x


# ---------------- deterministic parameter init ----------------

def init_params(key, num_embeddings, embedding_dim, num_layers,
                augmentation_factor, max_length):
    E = embedding_dim
    H = E * augmentation_factor
    keys = jax.random.split(key, 2 + num_layers)
    params = {
        "tok_emb": 0.02 * jax.random.normal(keys[0], (num_embeddings, E), jnp.float32),
        "pos_emb": 0.02 * jax.random.normal(keys[1], (max_length, E), jnp.float32),
        "layers": [],
    }
    for i in range(num_layers):
        lk = jax.random.split(keys[2 + i], 12)
        lin = lambda k, fi, fo: (jax.random.normal(k, (fi, fo), jnp.float32)
                                 / jnp.sqrt(jnp.float32(fi)))
        bias = lambda k, fo: 0.01 * jax.random.normal(k, (1, fo), jnp.float32)
        params["layers"].append(dict(
            wq=lin(lk[0], E, E), bq=bias(lk[1], E),
            wk=lin(lk[2], E, E), bk=bias(lk[3], E),
            wv=lin(lk[4], E, E), bv=bias(lk[5], E),
            lna_g=jnp.ones((1, E), jnp.float32), lna_b=jnp.zeros((1, E), jnp.float32),
            w1=lin(lk[6], E, E), b1=bias(lk[7], E),
            ln1_g=jnp.ones((1, E), jnp.float32), ln1_b=jnp.zeros((1, E), jnp.float32),
            wa1=lin(lk[8], E, H), ba1=bias(lk[9], H),
            wa2=lin(lk[10], H, E), ba2=bias(lk[11], E),
            ln2_g=jnp.ones((1, E), jnp.float32), ln2_b=jnp.zeros((1, E), jnp.float32),
        ))
    return params


if __name__ == "__main__":
    # Small shapes consistent with the module's forward.
    num_embeddings = 50
    embedding_dim = 32
    num_layers = 2
    heads = 4
    augmentation_factor = 2
    max_length = 16
    N, D = 2, 8

    key = jax.random.PRNGKey(0)
    pkey, tkey = jax.random.split(key)
    params = init_params(pkey, num_embeddings, embedding_dim, num_layers,
                         augmentation_factor, max_length)

    tok_idx = jax.random.randint(tkey, (N, D), 0, num_embeddings)
    # pad_mask: 1 = keep, 0 = pad (mask last two key positions of batch element 1)
    pad_mask = jnp.ones((N, 1, D), jnp.float32)
    pad_mask = pad_mask.at[1, 0, -2:].set(0.0)

    out = encoder_forward(params, tok_idx, pad_mask, heads=heads)
    out = jax.block_until_ready(out)

    ref = jax.block_until_ready(ref_forward(params, tok_idx, pad_mask, heads=heads))
    assert out.shape == (N, D, embedding_dim)
    # Tolerance accounts for bf16 MXU inputs (f32 accumulation) and the EUP
    # approximate reciprocal; outputs are LayerNormed (O(1)), so any structural
    # / masking / head-layout bug would produce O(1) errors and still be caught.
    assert jnp.allclose(out, ref, rtol=5e-2, atol=7.5e-2), "mismatch vs reference"

    print("KERNEL_OK")
</pallas_src>

<mosaic_0001>
module attributes {stable_mosaic.version = 11 : i64} {
  func.func @transformer_block_kernel(%arg0: i32, %arg1: memref<2x8x32xf32, #tpu.memory_space<vmem>>, %arg2: memref<2x1x8xf32, #tpu.memory_space<vmem>>, %arg3: memref<32x96xbf16, #tpu.memory_space<vmem>>, %arg4: memref<1x96xf32, #tpu.memory_space<vmem>>, %arg5: memref<1x32xf32, #tpu.memory_space<vmem>>, %arg6: memref<1x32xf32, #tpu.memory_space<vmem>>, %arg7: memref<32x32xbf16, #tpu.memory_space<vmem>>, %arg8: memref<1x32xf32, #tpu.memory_space<vmem>>, %arg9: memref<1x32xf32, #tpu.memory_space<vmem>>, %arg10: memref<1x32xf32, #tpu.memory_space<vmem>>, %arg11: memref<32x64xbf16, #tpu.memory_space<vmem>>, %arg12: memref<1x64xf32, #tpu.memory_space<vmem>>, %arg13: memref<64x32xbf16, #tpu.memory_space<vmem>>, %arg14: memref<1x32xf32, #tpu.memory_space<vmem>>, %arg15: memref<1x32xf32, #tpu.memory_space<vmem>>, %arg16: memref<1x32xf32, #tpu.memory_space<vmem>>, %arg17: memref<2x8x32xf32, #tpu.memory_space<vmem>>) attributes {dimension_semantics = [#tpu.dimension_semantics<parallel>], iteration_bounds = array<i64: 1>, scalar_prefetch = 0 : i64, scratch_operands = 0 : i64, tpu.core_type = #tpu.core_type<tc>, window_params = [{transform_indices = @transform_0, window_bounds = array<i64: 2, 8, 32>}, {transform_indices = @transform_1, window_bounds = array<i64: 2, 1, 8>}, {pipeline_mode = #tpu.pipeline_mode<synchronous>, transform_indices = @transform_2, window_bounds = array<i64: 32, 96>}, {pipeline_mode = #tpu.pipeline_mode<synchronous>, transform_indices = @transform_3, window_bounds = array<i64: 1, 96>}, {pipeline_mode = #tpu.pipeline_mode<synchronous>, transform_indices = @transform_4, window_bounds = array<i64: 1, 32>}, {pipeline_mode = #tpu.pipeline_mode<synchronous>, transform_indices = @transform_5, window_bounds = array<i64: 1, 32>}, {pipeline_mode = #tpu.pipeline_mode<synchronous>, transform_indices = @transform_6, window_bounds = array<i64: 32, 32>}, {pipeline_mode = #tpu.pipeline_mode<synchronous>, transform_indices = @transform_7, window_bounds = array<i64: 1, 32>}, {pipeline_mode = #tpu.pipeline_mode<synchronous>, transform_indices = @transform_8, window_bounds = array<i64: 1, 32>}, {pipeline_mode = #tpu.pipeline_mode<synchronous>, transform_indices = @transform_9, window_bounds = array<i64: 1, 32>}, {pipeline_mode = #tpu.pipeline_mode<synchronous>, transform_indices = @transform_10, window_bounds = array<i64: 32, 64>}, {pipeline_mode = #tpu.pipeline_mode<synchronous>, transform_indices = @transform_11, window_bounds = array<i64: 1, 64>}, {pipeline_mode = #tpu.pipeline_mode<synchronous>, transform_indices = @transform_12, window_bounds = array<i64: 64, 32>}, {pipeline_mode = #tpu.pipeline_mode<synchronous>, transform_indices = @transform_13, window_bounds = array<i64: 1, 32>}, {pipeline_mode = #tpu.pipeline_mode<synchronous>, transform_indices = @transform_14, window_bounds = array<i64: 1, 32>}, {pipeline_mode = #tpu.pipeline_mode<synchronous>, transform_indices = @transform_15, window_bounds = array<i64: 1, 32>}, {transform_indices = @transform_16, window_bounds = array<i64: 2, 8, 32>}]} {
    %c0 = arith.constant 0 : index
    %c0_0 = arith.constant 0 : index
    %c0_1 = arith.constant 0 : index
    %0 = vector.load %arg1[%c0, %c0_0, %c0_1] : memref<2x8x32xf32, #tpu.memory_space<vmem>>, vector<2x8x32xf32>
    %1 = vector.shape_cast %0 : vector<2x8x32xf32> to vector<16x32xf32>
    %c0_2 = arith.constant 0 : index
    %c0_3 = arith.constant 0 : index
    %c0_4 = arith.constant 0 : index
    %2 = vector.load %arg2[%c0_2, %c0_3, %c0_4] : memref<2x1x8xf32, #tpu.memory_space<vmem>>, vector<2x1x8xf32>
    %3 = arith.truncf %1 : vector<16x32xf32> to vector<16x32xbf16>
    %c0_5 = arith.constant 0 : index
    %c0_6 = arith.constant 0 : index
    %4 = vector.load %arg3[%c0_5, %c0_6] : memref<32x96xbf16, #tpu.memory_space<vmem>>, vector<32x96xbf16>
    %cst = arith.constant dense<0.000000e+00> : vector<16x96xf32>
    %5 = tpu.matmul %3, %4, %cst {dimension_numbers = #tpu.dot_dimension_numbers<[1], [0], [0], [1], [0, 0, 1, 1], [], []>} : vector<16x32xbf16>, vector<32x96xbf16>, vector<16x96xf32> -> vector<16x96xf32>
    %c0_7 = arith.constant 0 : index
    %c0_8 = arith.constant 0 : index
    %6 = vector.load %arg4[%c0_7, %c0_8] : memref<1x96xf32, #tpu.memory_space<vmem>>, vector<1x96xf32>
    %7 = vector.broadcast %6 : vector<1x96xf32> to vector<16x96xf32>
    %8 = arith.addf %5, %7 : vector<16x96xf32>
    %9 = vector.shape_cast %8 : vector<16x96xf32> to vector<2x8x96xf32>
    %10 = vector.extract_strided_slice %9 {offsets = [0, 0, 0], sizes = [2, 8, 8], strides = [1, 1, 1]} : vector<2x8x96xf32> to vector<2x8x8xf32>
    %11 = vector.extract_strided_slice %9 {offsets = [0, 0, 8], sizes = [2, 8, 8], strides = [1, 1, 1]} : vector<2x8x96xf32> to vector<2x8x8xf32>
    %12 = vector.extract_strided_slice %9 {offsets = [0, 0, 16], sizes = [2, 8, 8], strides = [1, 1, 1]} : vector<2x8x96xf32> to vector<2x8x8xf32>
    %13 = vector.extract_strided_slice %9 {offsets = [0, 0, 24], sizes = [2, 8, 8], strides = [1, 1, 1]} : vector<2x8x96xf32> to vector<2x8x8xf32>
    %14 = vector.shape_cast %10 : vector<2x8x8xf32> to vector<2x1x8x8xf32>
    %15 = vector.shape_cast %11 : vector<2x8x8xf32> to vector<2x1x8x8xf32>
    %16 = vector.shape_cast %12 : vector<2x8x8xf32> to vector<2x1x8x8xf32>
    %17 = vector.shape_cast %13 : vector<2x8x8xf32> to vector<2x1x8x8xf32>
    %18 = tpu.concatenate %14, %15, %16, %17 in 1 : vector<2x1x8x8xf32>, vector<2x1x8x8xf32>, vector<2x1x8x8xf32>, vector<2x1x8x8xf32> -> vector<2x4x8x8xf32>
    %19 = vector.shape_cast %18 : vector<2x4x8x8xf32> to vector<8x8x8xf32>
    %20 = arith.truncf %19 : vector<8x8x8xf32> to vector<8x8x8xbf16>
    %21 = vector.extract_strided_slice %9 {offsets = [0, 0, 32], sizes = [2, 8, 8], strides = [1, 1, 1]} : vector<2x8x96xf32> to vector<2x8x8xf32>
    %22 = vector.extract_strided_slice %9 {offsets = [0, 0, 40], sizes = [2, 8, 8], strides = [1, 1, 1]} : vector<2x8x96xf32> to vector<2x8x8xf32>
    %23 = vector.extract_strided_slice %9 {offsets = [0, 0, 48], sizes = [2, 8, 8], strides = [1, 1, 1]} : vector<2x8x96xf32> to vector<2x8x8xf32>
    %24 = vector.extract_strided_slice %9 {offsets = [0, 0, 56], sizes = [2, 8, 8], strides = [1, 1, 1]} : vector<2x8x96xf32> to vector<2x8x8xf32>
    %25 = vector.shape_cast %21 : vector<2x8x8xf32> to vector<2x1x8x8xf32>
    %26 = vector.shape_cast %22 : vector<2x8x8xf32> to vector<2x1x8x8xf32>
    %27 = vector.shape_cast %23 : vector<2x8x8xf32> to vector<2x1x8x8xf32>
    %28 = vector.shape_cast %24 : vector<2x8x8xf32> to vector<2x1x8x8xf32>
    %29 = tpu.concatenate %25, %26, %27, %28 in 1 : vector<2x1x8x8xf32>, vector<2x1x8x8xf32>, vector<2x1x8x8xf32>, vector<2x1x8x8xf32> -> vector<2x4x8x8xf32>
    %30 = vector.shape_cast %29 : vector<2x4x8x8xf32> to vector<8x8x8xf32>
    %31 = arith.truncf %30 : vector<8x8x8xf32> to vector<8x8x8xbf16>
    %32 = vector.extract_strided_slice %9 {offsets = [0, 0, 64], sizes = [2, 8, 8], strides = [1, 1, 1]} : vector<2x8x96xf32> to vector<2x8x8xf32>
    %33 = vector.extract_strided_slice %9 {offsets = [0, 0, 72], sizes = [2, 8, 8], strides = [1, 1, 1]} : vector<2x8x96xf32> to vector<2x8x8xf32>
    %34 = vector.extract_strided_slice %9 {offsets = [0, 0, 80], sizes = [2, 8, 8], strides = [1, 1, 1]} : vector<2x8x96xf32> to vector<2x8x8xf32>
    %35 = vector.extract_strided_slice %9 {offsets = [0, 0, 88], sizes = [2, 8, 8], strides = [1, 1, 1]} : vector<2x8x96xf32> to vector<2x8x8xf32>
    %36 = vector.shape_cast %32 : vector<2x8x8xf32> to vector<2x1x8x8xf32>
    %37 = vector.shape_cast %33 : vector<2x8x8xf32> to vector<2x1x8x8xf32>
    %38 = vector.shape_cast %34 : vector<2x8x8xf32> to vector<2x1x8x8xf32>
    %39 = vector.shape_cast %35 : vector<2x8x8xf32> to vector<2x1x8x8xf32>
    %40 = tpu.concatenate %36, %37, %38, %39 in 1 : vector<2x1x8x8xf32>, vector<2x1x8x8xf32>, vector<2x1x8x8xf32>, vector<2x1x8x8xf32> -> vector<2x4x8x8xf32>
    %41 = vector.shape_cast %40 : vector<2x4x8x8xf32> to vector<8x8x8xf32>
    %42 = arith.truncf %41 : vector<8x8x8xf32> to vector<8x8x8xbf16>
    "tpu.trace_start"() <{level = 10 : i32, message = "zqd,zkd->zqk"}> : () -> ()
    %cst_9 = arith.constant dense<0.000000e+00> : vector<8x8x8xf32>
    %43 = tpu.matmul %20, %31, %cst_9 {dimension_numbers = #tpu.dot_dimension_numbers<[2], [2], [1], [1], [0, 0, 0, 1, 1, 1], [0], [0]>} : vector<8x8x8xbf16>, vector<8x8x8xbf16>, vector<8x8x8xf32> -> vector<8x8x8xf32>
    "tpu.trace_stop"() : () -> ()
    %44 = vector.shape_cast %43 : vector<8x8x8xf32> to vector<2x4x8x8xf32>
    %45 = vector.shape_cast %2 : vector<2x1x8xf32> to vector<2x1x1x8xf32>
    %46 = vector.broadcast %45 : vector<2x1x1x8xf32> to vector<2x4x8x8xf32>
    %47 = arith.addf %44, %46 : vector<2x4x8x8xf32>
    %cst_10 = arith.constant dense<0xFF800000> : vector<2x4x8xf32>
    %48 = vector.multi_reduction <maximumf>, %47, %cst_10 [3] : vector<2x4x8x8xf32> to vector<2x4x8xf32>
    %49 = vector.shape_cast %48 : vector<2x4x8xf32> to vector<2x4x8x1xf32>
    %50 = vector.broadcast %49 : vector<2x4x8x1xf32> to vector<2x4x8x8xf32>
    %51 = arith.subf %47, %50 : vector<2x4x8x8xf32>
    %52 = math.exp %51 : vector<2x4x8x8xf32>
    %cst_11 = arith.constant dense<0.000000e+00> : vector<2x4x8xf32>
    %53 = vector.multi_reduction <add>, %52, %cst_11 [3] : vector<2x4x8x8xf32> to vector<2x4x8xf32>
    %54 = vector.shape_cast %53 : vector<2x4x8xf32> to vector<2x4x8x1xf32>
    %55 = tpu.reciprocal %54 {approx = true} : vector<2x4x8x1xf32> -> vector<2x4x8x1xf32>
    %56 = vector.broadcast %55 : vector<2x4x8x1xf32> to vector<2x4x8x8xf32>
    %57 = arith.mulf %52, %56 : vector<2x4x8x8xf32>
    %58 = vector.shape_cast %57 : vector<2x4x8x8xf32> to vector<8x8x8xf32>
    %59 = arith.truncf %58 : vector<8x8x8xf32> to vector<8x8x8xbf16>
    "tpu.trace_start"() <{level = 10 : i32, message = "zqk,zkd->zqd"}> : () -> ()
    %cst_12 = arith.constant dense<0.000000e+00> : vector<8x8x8xf32>
    %60 = tpu.matmul %59, %42, %cst_12 {dimension_numbers = #tpu.dot_dimension_numbers<[2], [1], [1], [2], [0, 0, 0, 1, 1, 2], [0], [0]>} : vector<8x8x8xbf16>, vector<8x8x8xbf16>, vector<8x8x8xf32> -> vector<8x8x8xf32>
    "tpu.trace_stop"() : () -> ()
    %61 = vector.shape_cast %60 : vector<8x8x8xf32> to vector<2x4x8x8xf32>
    %62 = vector.extract_strided_slice %61 {offsets = [0, 0, 0, 0], sizes = [2, 1, 8, 8], strides = [1, 1, 1, 1]} : vector<2x4x8x8xf32> to vector<2x1x8x8xf32>
    %63 = vector.shape_cast %62 : vector<2x1x8x8xf32> to vector<2x8x8xf32>
    %64 = vector.extract_strided_slice %61 {offsets = [0, 1, 0, 0], sizes = [2, 1, 8, 8], strides = [1, 1, 1, 1]} : vector<2x4x8x8xf32> to vector<2x1x8x8xf32>
    %65 = vector.shape_cast %64 : vector<2x1x8x8xf32> to vector<2x8x8xf32>
    %66 = vector.extract_strided_slice %61 {offsets = [0, 2, 0, 0], sizes = [2, 1, 8, 8], strides = [1, 1, 1, 1]} : vector<2x4x8x8xf32> to vector<2x1x8x8xf32>
    %67 = vector.shape_cast %66 : vector<2x1x8x8xf32> to vector<2x8x8xf32>
    %68 = vector.extract_strided_slice %61 {offsets = [0, 3, 0, 0], sizes = [2, 1, 8, 8], strides = [1, 1, 1, 1]} : vector<2x4x8x8xf32> to vector<2x1x8x8xf32>
    %69 = vector.shape_cast %68 : vector<2x1x8x8xf32> to vector<2x8x8xf32>
    %70 = tpu.concatenate %63, %65, %67, %69 in 2 : vector<2x8x8xf32>, vector<2x8x8xf32>, vector<2x8x8xf32>, vector<2x8x8xf32> -> vector<2x8x32xf32>
    %71 = vector.shape_cast %70 : vector<2x8x32xf32> to vector<16x32xf32>
    %c0_13 = arith.constant 0 : index
    %c0_14 = arith.constant 0 : index
    %72 = vector.load %arg5[%c0_13, %c0_14] : memref<1x32xf32, #tpu.memory_space<vmem>>, vector<1x32xf32>
    %c0_15 = arith.constant 0 : index
    %c0_16 = arith.constant 0 : index
    %73 = vector.load %arg6[%c0_15, %c0_16] : memref<1x32xf32, #tpu.memory_space<vmem>>, vector<1x32xf32>
    %cst_17 = arith.constant dense<0.000000e+00> : vector<16xf32>
    %74 = vector.multi_reduction <add>, %71, %cst_17 [1] : vector<16x32xf32> to vector<16xf32>
    %75 = vector.shape_cast %74 : vector<16xf32> to vector<16x1xf32>
    %cst_18 = arith.constant 3.200000e+01 : f32
    %76 = vector.broadcast %cst_18 : f32 to vector<16x1xf32>
    %77 = arith.divf %75, %76 : vector<16x1xf32>
    %78 = vector.broadcast %77 : vector<16x1xf32> to vector<16x32xf32>
    %79 = arith.subf %71, %78 : vector<16x32xf32>
    %80 = arith.mulf %79, %79 : vector<16x32xf32>
    %cst_19 = arith.constant dense<0.000000e+00> : vector<16xf32>
    %81 = vector.multi_reduction <add>, %80, %cst_19 [1] : vector<16x32xf32> to vector<16xf32>
    %82 = vector.shape_cast %81 : vector<16xf32> to vector<16x1xf32>
    %cst_20 = arith.constant 3.200000e+01 : f32
    %83 = vector.broadcast %cst_20 : f32 to vector<16x1xf32>
    %84 = arith.divf %82, %83 : vector<16x1xf32>
    %85 = vector.broadcast %77 : vector<16x1xf32> to vector<16x32xf32>
    %86 = arith.subf %71, %85 : vector<16x32xf32>
    %cst_21 = arith.constant 9.99999974E-6 : f32
    %87 = vector.broadcast %cst_21 : f32 to vector<16x1xf32>
    %88 = arith.addf %84, %87 : vector<16x1xf32>
    %89 = math.rsqrt %88 : vector<16x1xf32>
    %90 = vector.broadcast %89 : vector<16x1xf32> to vector<16x32xf32>
    %91 = arith.mulf %86, %90 : vector<16x32xf32>
    %92 = vector.broadcast %72 : vector<1x32xf32> to vector<16x32xf32>
    %93 = arith.mulf %91, %92 : vector<16x32xf32>
    %94 = vector.broadcast %73 : vector<1x32xf32> to vector<16x32xf32>
    %95 = arith.addf %93, %94 : vector<16x32xf32>
    %96 = arith.truncf %95 : vector<16x32xf32> to vector<16x32xbf16>
    %c0_22 = arith.constant 0 : index
    %c0_23 = arith.constant 0 : index
    %97 = vector.load %arg7[%c0_22, %c0_23] : memref<32x32xbf16, #tpu.memory_space<vmem>>, vector<32x32xbf16>
    %cst_24 = arith.constant dense<0.000000e+00> : vector<16x32xf32>
    %98 = tpu.matmul %96, %97, %cst_24 {dimension_numbers = #tpu.dot_dimension_numbers<[1], [0], [0], [1], [0, 0, 1, 1], [], []>} : vector<16x32xbf16>, vector<32x32xbf16>, vector<16x32xf32> -> vector<16x32xf32>
    %c0_25 = arith.constant 0 : index
    %c0_26 = arith.constant 0 : index
    %99 = vector.load %arg8[%c0_25, %c0_26] : memref<1x32xf32, #tpu.memory_space<vmem>>, vector<1x32xf32>
    %100 = vector.broadcast %99 : vector<1x32xf32> to vector<16x32xf32>
    %101 = arith.addf %98, %100 : vector<16x32xf32>
    %102 = arith.addf %101, %1 : vector<16x32xf32>
    %c0_27 = arith.constant 0 : index
    %c0_28 = arith.constant 0 : index
    %103 = vector.load %arg9[%c0_27, %c0_28] : memref<1x32xf32, #tpu.memory_space<vmem>>, vector<1x32xf32>
    %c0_29 = arith.constant 0 : index
    %c0_30 = arith.constant 0 : index
    %104 = vector.load %arg10[%c0_29, %c0_30] : memref<1x32xf32, #tpu.memory_space<vmem>>, vector<1x32xf32>
    %cst_31 = arith.constant dense<0.000000e+00> : vector<16xf32>
    %105 = vector.multi_reduction <add>, %102, %cst_31 [1] : vector<16x32xf32> to vector<16xf32>
    %106 = vector.shape_cast %105 : vector<16xf32> to vector<16x1xf32>
    %cst_32 = arith.constant 3.200000e+01 : f32
    %107 = vector.broadcast %cst_32 : f32 to vector<16x1xf32>
    %108 = arith.divf %106, %107 : vector<16x1xf32>
    %109 = vector.broadcast %108 : vector<16x1xf32> to vector<16x32xf32>
    %110 = arith.subf %102, %109 : vector<16x32xf32>
    %111 = arith.mulf %110, %110 : vector<16x32xf32>
    %cst_33 = arith.constant dense<0.000000e+00> : vector<16xf32>
    %112 = vector.multi_reduction <add>, %111, %cst_33 [1] : vector<16x32xf32> to vector<16xf32>
    %113 = vector.shape_cast %112 : vector<16xf32> to vector<16x1xf32>
    %cst_34 = arith.constant 3.200000e+01 : f32
    %114 = vector.broadcast %cst_34 : f32 to vector<16x1xf32>
    %115 = arith.divf %113, %114 : vector<16x1xf32>
    %116 = vector.broadcast %108 : vector<16x1xf32> to vector<16x32xf32>
    %117 = arith.subf %102, %116 : vector<16x32xf32>
    %cst_35 = arith.constant 9.99999974E-6 : f32
    %118 = vector.broadcast %cst_35 : f32 to vector<16x1xf32>
    %119 = arith.addf %115, %118 : vector<16x1xf32>
    %120 = math.rsqrt %119 : vector<16x1xf32>
    %121 = vector.broadcast %120 : vector<16x1xf32> to vector<16x32xf32>
    %122 = arith.mulf %117, %121 : vector<16x32xf32>
    %123 = vector.broadcast %103 : vector<1x32xf32> to vector<16x32xf32>
    %124 = arith.mulf %122, %123 : vector<16x32xf32>
    %125 = vector.broadcast %104 : vector<1x32xf32> to vector<16x32xf32>
    %126 = arith.addf %124, %125 : vector<16x32xf32>
    %127 = arith.truncf %126 : vector<16x32xf32> to vector<16x32xbf16>
    %c0_36 = arith.constant 0 : index
    %c0_37 = arith.constant 0 : index
    %128 = vector.load %arg11[%c0_36, %c0_37] : memref<32x64xbf16, #tpu.memory_space<vmem>>, vector<32x64xbf16>
    %cst_38 = arith.constant dense<0.000000e+00> : vector<16x64xf32>
    %129 = tpu.matmul %127, %128, %cst_38 {dimension_numbers = #tpu.dot_dimension_numbers<[1], [0], [0], [1], [0, 0, 1, 1], [], []>} : vector<16x32xbf16>, vector<32x64xbf16>, vector<16x64xf32> -> vector<16x64xf32>
    %c0_39 = arith.constant 0 : index
    %c0_40 = arith.constant 0 : index
    %130 = vector.load %arg12[%c0_39, %c0_40] : memref<1x64xf32, #tpu.memory_space<vmem>>, vector<1x64xf32>
    %131 = vector.broadcast %130 : vector<1x64xf32> to vector<16x64xf32>
    %132 = arith.addf %129, %131 : vector<16x64xf32>
    %cst_41 = arith.constant 0.000000e+00 : f32
    %133 = vector.broadcast %cst_41 : f32 to vector<16x64xf32>
    %134 = arith.maximumf %132, %133 : vector<16x64xf32>
    %135 = arith.truncf %134 : vector<16x64xf32> to vector<16x64xbf16>
    %c0_42 = arith.constant 0 : index
    %c0_43 = arith.constant 0 : index
    %136 = vector.load %arg13[%c0_42, %c0_43] : memref<64x32xbf16, #tpu.memory_space<vmem>>, vector<64x32xbf16>
    %cst_44 = arith.constant dense<0.000000e+00> : vector<16x32xf32>
    %137 = tpu.matmul %135, %136, %cst_44 {dimension_numbers = #tpu.dot_dimension_numbers<[1], [0], [0], [1], [0, 0, 1, 1], [], []>} : vector<16x64xbf16>, vector<64x32xbf16>, vector<16x32xf32> -> vector<16x32xf32>
    %c0_45 = arith.constant 0 : index
    %c0_46 = arith.constant 0 : index
    %138 = vector.load %arg14[%c0_45, %c0_46] : memref<1x32xf32, #tpu.memory_space<vmem>>, vector<1x32xf32>
    %139 = vector.broadcast %138 : vector<1x32xf32> to vector<16x32xf32>
    %140 = arith.addf %137, %139 : vector<16x32xf32>
    %141 = arith.addf %140, %126 : vector<16x32xf32>
    %c0_47 = arith.constant 0 : index
    %c0_48 = arith.constant 0 : index
    %142 = vector.load %arg15[%c0_47, %c0_48] : memref<1x32xf32, #tpu.memory_space<vmem>>, vector<1x32xf32>
    %c0_49 = arith.constant 0 : index
    %c0_50 = arith.constant 0 : index
    %143 = vector.load %arg16[%c0_49, %c0_50] : memref<1x32xf32, #tpu.memory_space<vmem>>, vector<1x32xf32>
    %cst_51 = arith.constant dense<0.000000e+00> : vector<16xf32>
    %144 = vector.multi_reduction <add>, %141, %cst_51 [1] : vector<16x32xf32> to vector<16xf32>
    %145 = vector.shape_cast %144 : vector<16xf32> to vector<16x1xf32>
    %cst_52 = arith.constant 3.200000e+01 : f32
    %146 = vector.broadcast %cst_52 : f32 to vector<16x1xf32>
    %147 = arith.divf %145, %146 : vector<16x1xf32>
    %148 = vector.broadcast %147 : vector<16x1xf32> to vector<16x32xf32>
    %149 = arith.subf %141, %148 : vector<16x32xf32>
    %150 = arith.mulf %149, %149 : vector<16x32xf32>
    %cst_53 = arith.constant dense<0.000000e+00> : vector<16xf32>
    %151 = vector.multi_reduction <add>, %150, %cst_53 [1] : vector<16x32xf32> to vector<16xf32>
    %152 = vector.shape_cast %151 : vector<16xf32> to vector<16x1xf32>
    %cst_54 = arith.constant 3.200000e+01 : f32
    %153 = vector.broadcast %cst_54 : f32 to vector<16x1xf32>
    %154 = arith.divf %152, %153 : vector<16x1xf32>
    %155 = vector.broadcast %147 : vector<16x1xf32> to vector<16x32xf32>
    %156 = arith.subf %141, %155 : vector<16x32xf32>
    %cst_55 = arith.constant 9.99999974E-6 : f32
    %157 = vector.broadcast %cst_55 : f32 to vector<16x1xf32>
    %158 = arith.addf %154, %157 : vector<16x1xf32>
    %159 = math.rsqrt %158 : vector<16x1xf32>
    %160 = vector.broadcast %159 : vector<16x1xf32> to vector<16x32xf32>
    %161 = arith.mulf %156, %160 : vector<16x32xf32>
    %162 = vector.broadcast %142 : vector<1x32xf32> to vector<16x32xf32>
    %163 = arith.mulf %161, %162 : vector<16x32xf32>
    %164 = vector.broadcast %143 : vector<1x32xf32> to vector<16x32xf32>
    %165 = arith.addf %163, %164 : vector<16x32xf32>
    %166 = vector.shape_cast %165 : vector<16x32xf32> to vector<2x8x32xf32>
    %c0_56 = arith.constant 0 : index
    %c0_57 = arith.constant 0 : index
    %c0_58 = arith.constant 0 : index
    %167 = vector.load %arg17[%c0_56, %c0_57, %c0_58] : memref<2x8x32xf32, #tpu.memory_space<vmem>>, vector<2x8x32xf32>
    tpu.vector_store %arg17[%c0_56, %c0_57, %c0_58], %166 {strides = array<i32>} : memref<2x8x32xf32, #tpu.memory_space<vmem>>, vector<2x8x32xf32>,
    return
  }
  func.func @transform_0(%arg0: i32) -> (i32, i32, i32) {
    %c0_i32 = arith.constant 0 : i32
    %c0_i32_0 = arith.constant 0 : i32
    %c0_i32_1 = arith.constant 0 : i32
    return %arg0, %c0_i32, %c0_i32_0 : i32, i32, i32
  }
  func.func @transform_1(%arg0: i32) -> (i32, i32, i32) {
    %c0_i32 = arith.constant 0 : i32
    %c0_i32_0 = arith.constant 0 : i32
    %c0_i32_1 = arith.constant 0 : i32
    return %arg0, %c0_i32, %c0_i32_0 : i32, i32, i32
  }
  func.func @transform_2(%arg0: i32) -> (i32, i32) {
    %c0_i32 = arith.constant 0 : i32
    %c0_i32_0 = arith.constant 0 : i32
    %c0_i32_1 = arith.constant 0 : i32
    return %c0_i32, %c0_i32_0 : i32, i32
  }
  func.func @transform_3(%arg0: i32) -> (i32, i32) {
    %c0_i32 = arith.constant 0 : i32
    %c0_i32_0 = arith.constant 0 : i32
    %c0_i32_1 = arith.constant 0 : i32
    return %c0_i32, %c0_i32_0 : i32, i32
  }
  func.func @transform_4(%arg0: i32) -> (i32, i32) {
    %c0_i32 = arith.constant 0 : i32
    %c0_i32_0 = arith.constant 0 : i32
    %c0_i32_1 = arith.constant 0 : i32
    return %c0_i32, %c0_i32_0 : i32, i32
  }
  func.func @transform_5(%arg0: i32) -> (i32, i32) {
    %c0_i32 = arith.constant 0 : i32
    %c0_i32_0 = arith.constant 0 : i32
    %c0_i32_1 = arith.constant 0 : i32
    return %c0_i32, %c0_i32_0 : i32, i32
  }
  func.func @transform_6(%arg0: i32) -> (i32, i32) {
    %c0_i32 = arith.constant 0 : i32
    %c0_i32_0 = arith.constant 0 : i32
    %c0_i32_1 = arith.constant 0 : i32
    return %c0_i32, %c0_i32_0 : i32, i32
  }
  func.func @transform_7(%arg0: i32) -> (i32, i32) {
    %c0_i32 = arith.constant 0 : i32
    %c0_i32_0 = arith.constant 0 : i32
    %c0_i32_1 = arith.constant 0 : i32
    return %c0_i32, %c0_i32_0 : i32, i32
  }
  func.func @transform_8(%arg0: i32) -> (i32, i32) {
    %c0_i32 = arith.constant 0 : i32
    %c0_i32_0 = arith.constant 0 : i32
    %c0_i32_1 = arith.constant 0 : i32
    return %c0_i32, %c0_i32_0 : i32, i32
  }
  func.func @transform_9(%arg0: i32) -> (i32, i32) {
    %c0_i32 = arith.constant 0 : i32
    %c0_i32_0 = arith.constant 0 : i32
    %c0_i32_1 = arith.constant 0 : i32
    return %c0_i32, %c0_i32_0 : i32, i32
  }
  func.func @transform_10(%arg0: i32) -> (i32, i32) {
    %c0_i32 = arith.constant 0 : i32
    %c0_i32_0 = arith.constant 0 : i32
    %c0_i32_1 = arith.constant 0 : i32
    return %c0_i32, %c0_i32_0 : i32, i32
  }
  func.func @transform_11(%arg0: i32) -> (i32, i32) {
    %c0_i32 = arith.constant 0 : i32
    %c0_i32_0 = arith.constant 0 : i32
    %c0_i32_1 = arith.constant 0 : i32
    return %c0_i32, %c0_i32_0 : i32, i32
  }
  func.func @transform_12(%arg0: i32) -> (i32, i32) {
    %c0_i32 = arith.constant 0 : i32
    %c0_i32_0 = arith.constant 0 : i32
    %c0_i32_1 = arith.constant 0 : i32
    return %c0_i32, %c0_i32_0 : i32, i32
  }
  func.func @transform_13(%arg0: i32) -> (i32, i32) {
    %c0_i32 = arith.constant 0 : i32
    %c0_i32_0 = arith.constant 0 : i32
    %c0_i32_1 = arith.constant 0 : i32
    return %c0_i32, %c0_i32_0 : i32, i32
  }
  func.func @transform_14(%arg0: i32) -> (i32, i32) {
    %c0_i32 = arith.constant 0 : i32
    %c0_i32_0 = arith.constant 0 : i32
    %c0_i32_1 = arith.constant 0 : i32
    return %c0_i32, %c0_i32_0 : i32, i32
  }
  func.func @transform_15(%arg0: i32) -> (i32, i32) {
    %c0_i32 = arith.constant 0 : i32
    %c0_i32_0 = arith.constant 0 : i32
    %c0_i32_1 = arith.constant 0 : i32
    return %c0_i32, %c0_i32_0 : i32, i32
  }
  func.func @transform_16(%arg0: i32) -> (i32, i32, i32) {
    %c0_i32 = arith.constant 0 : i32
    %c0_i32_0 = arith.constant 0 : i32
    %c0_i32_1 = arith.constant 0 : i32
    return %arg0, %c0_i32, %c0_i32_0 : i32, i32, i32
  }
}

</mosaic_0001>

<bundles_post_ra>
// kernel: tpu_custom_call.1
= control target key start
LH: loop header
LB: loop body
LE: loop exit
PB: predicated region body
PF: predicated region fallthrough
CT: control target
= control target key end

     0   :  { %s2458_s0 = inlined_call_operand.vmem [shape: f32[2,8,32], index: 0, kind: input, shape index: {}]   ;;  %s2459_s1 = inlined_call_operand.vmem [shape: f32[2,1,8], index: 1, kind: input, shape index: {}]   ;;  %s2460_s2 = inlined_call_operand.vmem [shape: bf16[32,96], index: 2, kind: input, shape index: {}]   ;;  %s2461_s3 = inlined_call_operand.hbm [shape: f32[1,96], index: 3, kind: input, shape index: {}]   ;;  %s2462_s4 = inlined_call_operand.hbm [shape: f32[1,32], index: 4, kind: input, shape index: {}]   ;;  %s2463_s5 = inlined_call_operand.hbm [shape: f32[1,32], index: 5, kind: input, shape index: {}]   ;;  %s2464_s6 = inlined_call_operand.vmem [shape: bf16[32,32], index: 6, kind: input, shape index: {}]   ;;  %s2465_s7 = inlined_call_operand.hbm [shape: f32[1,32], index: 7, kind: input, shape index: {}]   ;;  %s2466_s8 = inlined_call_operand.hbm [shape: f32[1,32], index: 8, kind: input, shape index: {}]   ;;  %s2467_s9 = inlined_call_operand.hbm [shape: f32[1,32], index: 9, kind: input, shape index: {}]   ;;  %s2468_s10 = inlined_call_operand.vmem [shape: bf16[32,64], index: 10, kind: input, shape index: {}]   ;;  %s2469_s11 = inlined_call_operand.vmem [shape: f32[1,64], index: 11, kind: input, shape index: {}]   ;;  %s2470_s12 = inlined_call_operand.vmem [shape: bf16[64,32], index: 12, kind: input, shape index: {}]   ;;  %s2471_s13 = inlined_call_operand.vmem [shape: f32[1,32], index: 13, kind: input, shape index: {}]   ;;  %s2472_s14 = inlined_call_operand.vmem [shape: f32[1,32], index: 14, kind: input, shape index: {}]   ;;  %s2473_s15 = inlined_call_operand.vmem [shape: f32[1,32], index: 15, kind: input, shape index: {}]   ;;  %s2474_s16 = inlined_call_operand.hbm [shape: f32[2,8,32], index: 16, kind: output, shape index: {}]  }
   0x1   :  { %2476 = sst [smem:[#allocation19_spill]] %s2458_s0 }
   0x2   :  { %21 = vsyncpa [#allocation3], 0 }
   0x3   :  { %22 = vsyncpa [#allocation6], 0 }
   0x4   :  { %23 = vsyncpa [#allocation9], 0 }
   0x5   :  { %24 = vsyncpa [#allocation12], 0 }
   0x6   :  { %25 = vsyncpa [#allocation4], 0  ;;  %s1990_s21 = smov [#allocation5]   ;;  %s1991_s23 = smov [#allocation8]  }
   0x7   :  { %s48_s22 = sshll.u32 %s1990_s21, 4  ;;  %s70_s24 = sshll.u32 %s1991_s23, 4  ;;  %s49_s22 = int_to_ptr.vmem [resolvable:$true] %s48_s22  ;;  %s71_s24 = int_to_ptr.vmem [resolvable:$true] %s70_s24 }
   0x8   :  { %s1826_s27 = scalar_lea.hbm %s2462_s4, 16 }
   0x9   :  { %p1827_p0 = scmp.ne.s32.totalorder %s2462_s4, %s1826_s27  ;;  %p1830_p1 = scmp.lt.u32.totalorder %s1826_s27, %s2462_s4 }
   0xb   :  { %p1832_p2 = pnand %p1830_p1, %p1827_p0 }
   0xd   :  { %1835 = shalt.err (!%p1832_p2)
}
   0xe   :  { %s1836_s17 = scalar_lea.vmem %s49_s22, 16  ;;  %s1840_s18 = scalar_lea.vmem %s49_s22, 32 }
   0xf   :  { %p1837_p3 = scmp.ne.s32.totalorder %s49_s22, %s1836_s17  ;;  %p1841_p4 = scmp.lt.s32.totalorder %s49_s22, %s49_s22 }
  0x10   :  { %p1842_p5 = scmp.lt.s32.totalorder %s1840_s18, %s1836_s17 }
  0x12   :  { %p1843_p6 = por %p1842_p5, %p1841_p4 }
  0x14   :  { %p1844_p7 = pnand %p1843_p6, %p1837_p3 }
  0x16   :  { %1847 = shalt.err (!%p1844_p7)
}
  0x17   :  { %51 = dma.hbm_to_vmem [thread:$0]  %s2462_s4, 16, %s49_s22, [#allocation6]  }
  0x18   :  { %s1848_s25 = scalar_lea.hbm %s2465_s7, 16 }
  0x19   :  { %p1849_p8 = scmp.ne.s32.totalorder %s2465_s7, %s1848_s25  ;;  %p1852_p9 = scmp.lt.u32.totalorder %s1848_s25, %s2465_s7 }
  0x1b   :  { %p1854_p10 = pnand %p1852_p9, %p1849_p8 }
  0x1d   :  { %1857 = shalt.err (!%p1854_p10)
}
  0x1e   :  { %s1858_s30 = scalar_lea.vmem %s71_s24, 16  ;;  %s1862_s0 = scalar_lea.vmem %s71_s24, 32 }
  0x1f   :  { %p1859_p11 = scmp.ne.s32.totalorder %s71_s24, %s1858_s30  ;;  %p1863_p12 = scmp.lt.s32.totalorder %s71_s24, %s71_s24 }
  0x20   :  { %p1864_p13 = scmp.lt.s32.totalorder %s1862_s0, %s1858_s30 }
  0x22   :  { %p1865_p0 = por %p1864_p13, %p1863_p12 }
  0x24   :  { %p1866_p1 = pnand %p1865_p0, %p1859_p11 }
  0x26   :  { %1869 = shalt.err (!%p1866_p1)
}
  0x27   :  { %73 = dma.hbm_to_vmem [thread:$0]  %s2465_s7, 16, %s71_s24, [#allocation9]  }
  0x28   :  { %s1992_s17 = smov [#allocation2]   ;;  %s1993_s19 = smov [#allocation7]  }
  0x29   :  { %s38_s18 = sshll.u32 %s1992_s17, 4  ;;  %s58_s20 = sshll.u32 %s1993_s19, 4  ;;  %s39_s18 = int_to_ptr.vmem [resolvable:$true] %s38_s18  ;;  %s59_s20 = int_to_ptr.vmem [resolvable:$true] %s58_s20 }
  0x2a   :  { %s1870_s25 = scalar_lea.hbm %s2461_s3, 16 }
  0x2b   :  { %p1871_p2 = scmp.ne.s32.totalorder %s2461_s3, %s1870_s25  ;;  %p1874_p3 = scmp.lt.u32.totalorder %s1870_s25, %s2461_s3 }
  0x2d   :  { %p1876_p4 = pnand %p1874_p3, %p1871_p2 }
  0x2f   :  { %1879 = shalt.err (!%p1876_p4)
}
  0x30   :  { %s1880_s7 = scalar_lea.vmem %s39_s18, 16  ;;  %s1884_s24 = scalar_lea.vmem %s39_s18, 32 }
  0x31   :  { %p1881_p5 = scmp.ne.s32.totalorder %s39_s18, %s1880_s7  ;;  %p1885_p6 = scmp.lt.s32.totalorder %s39_s18, %s39_s18 }
  0x32   :  { %p1886_p7 = scmp.lt.s32.totalorder %s1884_s24, %s1880_s7 }
  0x34   :  { %p1887_p8 = por %p1886_p7, %p1885_p6 }
  0x36   :  { %p1888_p9 = pnand %p1887_p8, %p1881_p5 }
  0x38   :  { %1891 = shalt.err (!%p1888_p9)
}
  0x39   :  { %41 = dma.hbm_to_vmem [thread:$0]  %s2461_s3, 16, %s39_s18, [#allocation3]  }
  0x3a   :  { %s1892_s17 = scalar_lea.hbm %s2463_s5, 16 }
  0x3b   :  { %p1893_p10 = scmp.ne.s32.totalorder %s2463_s5, %s1892_s17  ;;  %p1896_p11 = scmp.lt.u32.totalorder %s1892_s17, %s2463_s5 }
  0x3d   :  { %p1898_p12 = pnand %p1896_p11, %p1893_p10 }
  0x3f   :  { %1901 = shalt.err (!%p1898_p12)
}
  0x40   :  { %s1902_s26 = scalar_lea.vmem %s59_s20, 16  ;;  %s1906_s27 = scalar_lea.vmem %s59_s20, 32 }
  0x41   :  { %p1903_p13 = scmp.ne.s32.totalorder %s59_s20, %s1902_s26  ;;  %p1907_p0 = scmp.lt.s32.totalorder %s59_s20, %s59_s20 }
  0x42   :  { %p1908_p1 = scmp.lt.s32.totalorder %s1906_s27, %s1902_s26 }
  0x44   :  { %p1909_p2 = por %p1908_p1, %p1907_p0 }
  0x46   :  { %p1910_p3 = pnand %p1909_p2, %p1903_p13 }
  0x48   :  { %1913 = shalt.err (!%p1910_p3)
}
  0x49   :  { %61 = dma.hbm_to_vmem [thread:$0]  %s2463_s5, 16, %s59_s20, [#allocation6]  }
  0x4a   :  { %s1994_s28 = smov [#allocation10]   ;;  %s1995_s7 = smov [#allocation11]  }
  0x4b   :  { %s80_s29 = sshll.u32 %s1994_s28, 4  ;;  %s90_s24 = sshll.u32 %s1995_s7, 4  ;;  %s81_s29 = int_to_ptr.vmem [resolvable:$true] %s80_s29  ;;  %s91_s24 = int_to_ptr.vmem [resolvable:$true] %s90_s24 }
  0x4c   :  { %s1914_s4 = scalar_lea.hbm %s2466_s8, 16 }
  0x4d   :  { %p1915_p4 = scmp.ne.s32.totalorder %s2466_s8, %s1914_s4  ;;  %p1918_p5 = scmp.lt.u32.totalorder %s1914_s4, %s2466_s8 }
  0x4f   :  { %p1920_p6 = pnand %p1918_p5, %p1915_p4 }
  0x51   :  { %1923 = shalt.err (!%p1920_p6)
}
  0x52   :  { %s1924_s5 = scalar_lea.vmem %s81_s29, 16  ;;  %s1928_s20 = scalar_lea.vmem %s81_s29, 32 }
  0x53   :  { %p1925_p7 = scmp.ne.s32.totalorder %s81_s29, %s1924_s5  ;;  %p1929_p8 = scmp.lt.s32.totalorder %s81_s29, %s81_s29 }
  0x54   :  { %p1930_p9 = scmp.lt.s32.totalorder %s1928_s20, %s1924_s5 }
  0x56   :  { %p1931_p10 = por %p1930_p9, %p1929_p8 }
  0x58   :  { %p1932_p11 = pnand %p1931_p10, %p1925_p7 }
  0x5a   :  { %1935 = shalt.err (!%p1932_p11)
}
  0x5b   :  { %83 = dma.hbm_to_vmem [thread:$0]  %s2466_s8, 16, %s81_s29, [#allocation9]  }
  0x5c   :  { %s1936_s3 = scalar_lea.hbm %s2467_s9, 16 }
  0x5d   :  { %p1937_p12 = scmp.ne.s32.totalorder %s2467_s9, %s1936_s3  ;;  %p1940_p13 = scmp.lt.u32.totalorder %s1936_s3, %s2467_s9 }
  0x5f   :  { %p1942_p0 = pnand %p1940_p13, %p1937_p12 }
  0x61   :  { %1945 = shalt.err (!%p1942_p0)
}
  0x62   :  { %s1946_s0 = scalar_lea.vmem %s91_s24, 16  ;;  %s1950_s4 = scalar_lea.vmem %s91_s24, 32 }
  0x63   :  { %p1947_p1 = scmp.ne.s32.totalorder %s91_s24, %s1946_s0  ;;  %p1951_p2 = scmp.lt.s32.totalorder %s91_s24, %s91_s24 }
  0x64   :  { %p1952_p3 = scmp.lt.s32.totalorder %s1950_s4, %s1946_s0 }
  0x66   :  { %p1953_p4 = por %p1952_p3, %p1951_p2 }
  0x68   :  { %p1954_p5 = pnand %p1953_p4, %p1947_p1 }
  0x6a   :  { %1957 = shalt.err (!%p1954_p5)
}
  0x6b   :  { %93 = dma.hbm_to_vmem [thread:$0]  %s2467_s9, 16, %s91_s24, [#allocation12]  }
  0x6c   :  { %1980 = dma.done.wait [#allocation3], 16  }
  0x6d   :  { %1981 = vsyncadd [#allocation3], 4294967280 }
  0x6e   :  { %1982 = dma.done.wait [#allocation6], 32  }
  0x6f   :  { %1983 = vsyncadd [#allocation6], 4294967264 }
  0x70   :  { %1984 = dma.done.wait [#allocation9], 32  }
  0x71   :  { %1985 = vsyncadd [#allocation9], 4294967264 }
  0x72   :  { %1986 = dma.done.wait [#allocation12], 16  }
  0x73   :  { %1987 = vsyncadd [#allocation12], 4294967280  ;;  %v1996_v0 = vmov 0.0   ;;  %vm1997_vm0 = vmmov 0   ;;  %v1772_v1 = vld [vmem:[%s2460_s2] sm:$0xff]   ;;  %v1773_v2 = vld [vmem:[%s2460_s2 + $0x8] sm:$0xff]  }
  0x74   :  { %1622 = vmatprep.subr.bf16.mxu0 %v1996_v0  ;;  %1626 = vmatprep.mubr.msk.bf16.mxu0 %vm1997_vm0, %v1996_v0  ;;  %s2477_s5 = sld [smem:[#allocation19_spill]]  ;;  %vm153_vm1 = vcmask 261120   ;;  %v1534_v6 = vld [vmem:[#allocation2] ss:$0 sm:$0xff]  ;;  %s1998_s2 = smov 104   ;;  %vm229_vm2 = vcmask 64512  }
  0x75   :  { %1630 = vmatprep.subr.bf16.mxu1 %v1996_v0  ;;  %1632 = vmatprep.mubr.msk.bf16.mxu1 %vm1997_vm0, %v1996_v0  ;;  %s1999_s25 = smov 120   ;;  %s2000_s26 = smov 112   ;;  %vm740_vm3 = vcmask 1043456   ;;  %v1546_v45 = vld [vmem:[%s2459_s1] ss:$0 sm:$0xff]  ;;  %vm1146_vm4 = vcmask 130048  }
  0x76   :  { %1623 = vmatpush3.bf16.msra.mxu0 %v1772_v1  ;;  %s2001_s27 = smov 96   ;;  %s2002_s3 = smov 64   ;;  %vm1149_vm5 = vcmask 195584   ;;  %vm1421_vm6 = vcmask 523264  }
  0x77   :  { %1624 = vmatprep.subr.bf16.mxu0 %v1996_v0  ;;  %s2004_s0 = smov 16   ;;  %s2005_s4 = smov 24  }
  0x78   :  { %s2006_s30 = smov [#allocation13]  }
  0x7a   :  { %v2180_v3 = vld [vmem:[%s2477_s5] sm:$0xff]  ;;  %v2185_v4 = vld [vmem:[%s2477_s5 + $0x8] sm:$0xff]  ;;  %1625 = vmatpush3.bf16.msra.mxu0 %v1773_v2 }
  0x7b   :  { %v129_v5 = vpack.c.bf16 %v2185_v4, %v2180_v3  ;;  %1636 = vmatprep.subr.bf16.mxu0 %v1996_v0 }
  0x7d   :  { %1627 = vmatmul.mubr.msk.bf16.vlgmr.msra.gmra.mrb[0].mxu0 %vm153_vm1, %v129_v5 }
  0x7e   :  { %1638 = vmatprep.mubr.msk.bf16.mxu0 %vm1997_vm0, %v1996_v0 }
 0x150   :  { %v191_v7 = vpop.f32.mrb[0].mxu0 }
 0x151   :  { %v192_v8 = vadd.f32 %v1534_v6, %v191_v7  ;;  %v1628_v9 = vpop.f32.mrb[1].mxu0  ;;  %v1547_v7 = vld [vmem:[%s2459_s1 + $0x1] ss:$0 sm:$0xff]  ;;  %s2003_s1 = smov 8  }
 0x152   :  { %v194_v10 = vpop.f32.mrb[2].mxu0 }
 0x153   :  { %212 = vrot.lane.b32.xlu1 %v192_v8, %s1998_s2  ;;  %200 = vrot.lane.b32.xlu0 %v192_v8, %s1999_s25  ;;  %v1629_v11 = vpop.f32.mrb[3].mxu0  ;;  %v195_v12 = vadd.f32 %v1534_v6, %v194_v10  ;;  %v218_v13 = vpack.c.bf16 %v192_v8, %v192_v8 }
 0x155   :  { %v2205_v23 = vpack.c.bf16 %v195_v12, %v195_v12 }
 0x157   :  { %206 = vrot.lane.b32.xlu0 %v192_v8, %s2000_s26  ;;  %202 = vrot.lane.b32.xlu1 %v195_v12, %s1999_s25 }
 0x15b   :  { %208 = vrot.lane.b32.xlu0 %v195_v12, %s2000_s26  ;;  %214 = vrot.lane.b32.xlu1 %v195_v12, %s1998_s2 }
 0x15f   :  { %227 = vrot.lane.b32.xlu0 %v218_v13, %s2001_s27 }
 0x1c5   :  { %v213_v14 = vpop.permute.xlu1 %212  ;;  %v201_v15 = vpop.permute.xlu0 %200 }
 0x1c6   :  { %v2194_v16 = vpack.c.bf16 %v201_v15, %v201_v15  ;;  %v2197_v19 = vpack.c.bf16 %v213_v14, %v213_v14 }
 0x1c8   :  { %277 = vrot.lane.b32.xlu1 %v2194_v16, %s2001_s27 }
 0x1c9   :  { %v207_v17 = vpop.permute.xlu0 %206  ;;  %v203_v18 = vpop.permute.xlu1 %202 }
 0x1ca   :  { %v2199_v20 = vpack.c.bf16 %v207_v17, %v207_v17  ;;  %v2203_v22 = vpack.c.bf16 %v203_v18, %v203_v18 }
 0x1cc   :  { %326 = vrot.lane.b32.xlu0 %v2199_v20, %s2001_s27  ;;  %375 = vrot.lane.b32.xlu1 %v2197_v19, %s2001_s27 }
 0x1cd   :  { %v209_v21 = vpop.permute.xlu0 %208  ;;  %v215_v24 = vpop.permute.xlu1 %214 }
 0x1ce   :  { %v2209_v26 = vpack.c.bf16 %v209_v21, %v209_v21  ;;  %v2211_v27 = vpack.c.bf16 %v215_v24, %v215_v24 }
 0x1d0   :  { %473 = vrot.lane.b32.xlu1 %v2203_v22, %s2001_s27  ;;  %424 = vrot.lane.b32.xlu0 %v2205_v23, %s2001_s27 }
 0x1d1   :  { %v228_v25 = vpop.permute.xlu0 %227 }
 0x1d2   :  { %v234_v28 = vsel %vm229_vm2, %v228_v25, 0 }
 0x1d3   :  { %1631 = vmatpush3.bf16.xpose.msra.mxu1 %v234_v28 }
 0x1d4   :  { %571 = vrot.lane.b32.xlu1 %v2211_v27, %s2001_s27  ;;  %522 = vrot.lane.b32.xlu0 %v2209_v26, %s2001_s27 }
 0x1d5   :  { %1642 = vmatprep.subr.bf16.mxu1 %v1996_v0 }
 0x1d8   :  { %735 = vrot.lane.b32.xlu1 %v218_v13, %s2002_s3 }
 0x1da   :  { %1633 = vmatmul.mubr.msk.bf16.vlgmr.msra.gmra.mrb[0].mxu1 %vm229_vm2, %v218_v13 }
 0x1db   :  { %1644 = vmatprep.mubr.msk.bf16.mxu1 %vm1997_vm0, %v1996_v0 }
 0x23a   :  { %v278_v29 = vpop.permute.xlu1 %277 }
 0x23b   :  { %v283_v30 = vsel %vm229_vm2, %v278_v29, 0 }
 0x23c   :  { %1637 = vmatpush3.bf16.xpose.msra.mxu0 %v283_v30 }
 0x23d   :  { %1648 = vmatprep.subr.bf16.mxu0 %v1996_v0 }
 0x23e   :  { %v327_v31 = vpop.permute.xlu0 %326  ;;  %v376_v33 = vpop.permute.xlu1 %375 }
 0x23f   :  { %v332_v32 = vsel %vm229_vm2, %v327_v31, 0  ;;  %v381_v34 = vsel %vm229_vm2, %v376_v33, 0 }
 0x240   :  { %1643 = vmatpush3.bf16.xpose.msra.mxu1 %v332_v32 }
 0x241   :  { %1654 = vmatprep.subr.bf16.mxu1 %v1996_v0 }
 0x242   :  { %v425_v35 = vpop.permute.xlu0 %424  ;;  %v474_v37 = vpop.permute.xlu1 %473 }
 0x243   :  { %1639 = vmatmul.mubr.msk.bf16.vlgmr.msra.gmra.mrb[4].mxu0 %vm229_vm2, %v2194_v16  ;;  %v430_v36 = vsel %vm229_vm2, %v425_v35, 0  ;;  %v479_v38 = vsel %vm229_vm2, %v474_v37, 0 }
 0x244   :  { %1649 = vmatpush3.bf16.xpose.msra.mxu0 %v381_v34  ;;  %1650 = vmatprep.mubr.msk.bf16.mxu0 %vm1997_vm0, %v1996_v0 }
 0x245   :  { %1660 = vmatprep.subr.bf16.mxu0 %v1996_v0 }
 0x246   :  { %v523_v39 = vpop.permute.xlu0 %522  ;;  %v572_v40 = vpop.permute.xlu1 %571 }
 0x247   :  { %1645 = vmatmul.mubr.msk.bf16.vlgmr.msra.gmra.mrb[4].mxu1 %vm229_vm2, %v2199_v20  ;;  %v528_v41 = vsel %vm229_vm2, %v523_v39, 0  ;;  %v577_v42 = vsel %vm229_vm2, %v572_v40, 0 }
 0x248   :  { %1655 = vmatpush3.bf16.xpose.msra.mxu1 %v430_v36  ;;  %1656 = vmatprep.mubr.msk.bf16.mxu1 %vm1997_vm0, %v1996_v0 }
 0x249   :  { %1666 = vmatprep.subr.bf16.mxu1 %v1996_v0 }
 0x24a   :  { %v736_v43 = vpop.permute.xlu1 %735 }
 0x24b   :  { %1651 = vmatmul.mubr.msk.bf16.vlgmr.msra.gmra.mrb[8].mxu0 %vm229_vm2, %v2197_v19  ;;  %v742_v44 = vsel %vm740_vm3, %v736_v43, 0 }
 0x24c   :  { %1661 = vmatpush3.bf16.xpose.msra.mxu0 %v479_v38  ;;  %1662 = vmatprep.mubr.msk.bf16.mxu0 %vm1997_vm0, %v1996_v0 }
 0x24d   :  { %1672 = vmatprep.subr.bf16.mxu0 %v1996_v0 }
 0x24f   :  { %1657 = vmatmul.mubr.msk.bf16.vlgmr.msra.gmra.mrb[8].mxu1 %vm229_vm2, %v2205_v23 }
 0x250   :  { %1667 = vmatpush3.bf16.xpose.msra.mxu1 %v528_v41  ;;  %1668 = vmatprep.mubr.msk.bf16.mxu1 %vm1997_vm0, %v1996_v0 }
 0x251   :  { %1678 = vmatprep.subr.bf16.mxu1 %v1996_v0 }
 0x253   :  { %1663 = vmatmul.mubr.msk.bf16.vlgmr.msra.gmra.mrb[12].mxu0 %vm229_vm2, %v2203_v22 }
 0x254   :  { %1673 = vmatpush3.bf16.xpose.msra.mxu0 %v577_v42  ;;  %1674 = vmatprep.mubr.msk.bf16.mxu0 %vm1997_vm0, %v1996_v0 }
 0x255   :  { %1684 = vmatprep.subr.bf16.mxu0 %v1996_v0 }
 0x257   :  { %1669 = vmatmul.mubr.msk.bf16.vlgmr.msra.gmra.mrb[12].mxu1 %vm229_vm2, %v2209_v26 }
 0x258   :  { %1679 = vmatpush3.bf16.msra.mxu1 %v742_v44  ;;  %1680 = vmatprep.mubr.msk.bf16.mxu1 %vm1997_vm0, %v1996_v0 }
 0x259   :  { %1690 = vmatprep.subr.bf16.mxu1 %v1996_v0 }
 0x25b   :  { %1675 = vmatmul.mubr.msk.bf16.vlgmr.msra.gmra.mrb[16].mxu0 %vm229_vm2, %v2211_v27 }
 0x25c   :  { %1686 = vmatprep.mubr.msk.bf16.mxu0 %vm1997_vm0, %v1996_v0 }
 0x2ad   :  { %v270_v46 = vpop.f32.mrb[0].mxu1 }
 0x2ae   :  { %v631_v47 = vadd.f32 %v1546_v45, %v270_v46  ;;  %v1634_v48 = vpop.f32.mrb[1].mxu1 }
 0x2af   :  { %v273_v49 = vpop.f32.mrb[2].mxu1 }
 0x2b0   :  { %v1635_v50 = vpop.f32.mrb[3].mxu1  ;;  %v639_v51 = vsel %vm229_vm2, %v631_v47, -inf }
 0x2b1   :  { %640 = vmax.xlane.f32.xlu0 %v639_v51 }
 0x316   :  { %v319_v52 = vpop.f32.mrb[4].mxu0 }
 0x317   :  { %v632_v53 = vadd.f32 %v1546_v45, %v319_v52  ;;  %v1640_v54 = vpop.f32.mrb[5].mxu0 }
 0x318   :  { %v322_v55 = vpop.f32.mrb[6].mxu0 }
 0x319   :  { %v1641_v56 = vpop.f32.mrb[7].mxu0  ;;  %v642_v57 = vsel %vm229_vm2, %v632_v53, -inf }
 0x31a   :  { %v368_v58 = vpop.f32.mrb[4].mxu1  ;;  %643 = vmax.xlane.f32.xlu1 %v642_v57 }
 0x31b   :  { %v633_v59 = vadd.f32 %v1546_v45, %v368_v58  ;;  %v1646_v60 = vpop.f32.mrb[5].mxu1 }
 0x31c   :  { %v371_v61 = vpop.f32.mrb[6].mxu1 }
 0x31d   :  { %v1647_v62 = vpop.f32.mrb[7].mxu1  ;;  %v645_v63 = vsel %vm229_vm2, %v633_v59, -inf }
 0x31e   :  { %646 = vmax.xlane.f32.xlu0 %v645_v63  ;;  %v417_v1 = vpop.f32.mrb[8].mxu0 }
 0x31f   :  { %v634_v2 = vadd.f32 %v1546_v45, %v417_v1  ;;  %v1652_v5 = vpop.f32.mrb[9].mxu0 }
 0x320   :  { %v420_v6 = vpop.f32.mrb[10].mxu0 }
 0x321   :  { %v1653_v8 = vpop.f32.mrb[11].mxu0  ;;  %v648_v9 = vsel %vm229_vm2, %v634_v2, -inf }
 0x322   :  { %v466_v10 = vpop.f32.mrb[8].mxu1  ;;  %649 = vmax.xlane.f32.xlu0 %v648_v9 }
 0x323   :  { %v2275_v11 = vadd.f32 %v1547_v7, %v466_v10  ;;  %v1658_v12 = vpop.f32.mrb[9].mxu1 }
 0x324   :  { %v469_v13 = vpop.f32.mrb[10].mxu1 }
 0x325   :  { %v1659_v14 = vpop.f32.mrb[11].mxu1  ;;  %v651_v15 = vsel %vm229_vm2, %v2275_v11, -inf }
 0x326   :  { %652 = vmax.xlane.f32.xlu1 %v651_v15  ;;  %v515_v17 = vpop.f32.mrb[12].mxu0 }
 0x327   :  { %v2279_v18 = vadd.f32 %v1547_v7, %v515_v17  ;;  %v1664_v21 = vpop.f32.mrb[13].mxu0 }
 0x328   :  { %v518_v24 = vpop.f32.mrb[14].mxu0 }
 0x329   :  { %v1665_v25 = vpop.f32.mrb[15].mxu0  ;;  %v654_v28 = vsel %vm229_vm2, %v2279_v18, -inf }
 0x32a   :  { %v564_v29 = vpop.f32.mrb[12].mxu1  ;;  %655 = vmax.xlane.f32.xlu0 %v654_v28 }
 0x32b   :  { %v637_v30 = vadd.f32 %v1547_v7, %v564_v29  ;;  %v1670_v31 = vpop.f32.mrb[13].mxu1 }
 0x32c   :  { %v567_v32 = vpop.f32.mrb[14].mxu1 }
 0x32d   :  { %v1671_v33 = vpop.f32.mrb[15].mxu1  ;;  %v657_v34 = vsel %vm229_vm2, %v637_v30, -inf }
 0x32e   :  { %658 = vmax.xlane.f32.xlu1 %v657_v34  ;;  %v613_v35 = vpop.f32.mrb[16].mxu0 }
 0x32f   :  { %v638_v36 = vadd.f32 %v1547_v7, %v613_v35  ;;  %v1676_v37 = vpop.f32.mrb[17].mxu0 }
 0x330   :  { %v616_v38 = vpop.f32.mrb[18].mxu0 }
 0x331   :  { %v1677_v39 = vpop.f32.mrb[19].mxu0  ;;  %v660_v40 = vsel %vm229_vm2, %v638_v36, -inf }
 0x332   :  { %661 = vmax.xlane.f32.xlu0 %v660_v40 }
 0x33e   :  { %v641_v41 = vpop.xlane.xlu0 %640 }
 0x33f   :  { %832 = vrot.lane.b32.xlu1 %v2199_v20, %s2002_s3  ;;  %v663_v42 = vsub.f32 %v631_v47, %v641_v41 }
 0x341   :  { %v671_v43 = vmul.f32 1.442695, %v663_v42 }
 0x343   :  { %880 = vrot.lane.b32.xlu1 %v2197_v19, %s2002_s3  ;;  %1782 = vpow2.f32 %v671_v43 }
 0x348   :  { %784 = vrot.lane.b32.xlu0 %v2194_v16, %s2002_s3 }
 0x34d   :  { %v2291_v44 = vpop.eup %1782 }
 0x34e   :  { %v687_v45 = vsel %vm229_vm2, %v2291_v44, 0.0 }
 0x367   :  { %688 = vadd.xlane.f32.xlu1 %v687_v45 }
 0x3a7   :  { %v644_v46 = vpop.xlane.xlu1 %643 }
 0x3a8   :  { %v664_v48 = vsub.f32 %v632_v53, %v644_v46 }
 0x3aa   :  { %v673_v49 = vmul.f32 1.442695, %v664_v48 }
 0x3ab   :  { %v647_v20 = vpop.xlane.xlu0 %646 }
 0x3ac   :  { %1784 = vpow2.f32 %v673_v49  ;;  %v665_v50 = vsub.f32 %v633_v59, %v647_v20 }
 0x3ae   :  { %v675_v19 = vmul.f32 1.442695, %v665_v50 }
 0x3af   :  { %v650_v51 = vpop.xlane.xlu0 %649 }
 0x3b0   :  { %1786 = vpow2.f32 %v675_v19  ;;  %v666_v16 = vsub.f32 %v634_v2, %v650_v51 }
 0x3b2   :  { %v677_v52 = vmul.f32 1.442695, %v666_v16 }
 0x3b3   :  { %v653_v62 = vpop.xlane.xlu1 %652 }
 0x3b4   :  { %1788 = vpow2.f32 %v677_v52  ;;  %v667_v63 = vsub.f32 %v2275_v11, %v653_v62 }
 0x3b6   :  { %v2295_v47 = vpop.eup %1784  ;;  %v679_v5 = vmul.f32 1.442695, %v667_v63 }
 0x3b7   :  { %v690_v54 = vsel %vm229_vm2, %v2295_v47, 0.0  ;;  %v656_v56 = vpop.xlane.xlu0 %655 }
 0x3b8   :  { %691 = vadd.xlane.f32.xlu0 %v690_v54  ;;  %v668_v2 = vsub.f32 %v2279_v18, %v656_v56  ;;  %1790 = vpow2.f32 %v679_v5 }
 0x3ba   :  { %v2299_v55 = vpop.eup %1786  ;;  %v681_v7 = vmul.f32 1.442695, %v668_v2 }
 0x3bb   :  { %v693_v53 = vsel %vm229_vm2, %v2299_v55, 0.0  ;;  %v659_v1 = vpop.xlane.xlu1 %658 }
 0x3bc   :  { %694 = vadd.xlane.f32.xlu1 %v693_v53  ;;  %v669_v6 = vsub.f32 %v637_v30, %v659_v1  ;;  %1792 = vpow2.f32 %v681_v7 }
 0x3be   :  { %v2303_v57 = vpop.eup %1788  ;;  %v683_v8 = vmul.f32 1.442695, %v669_v6 }
 0x3bf   :  { %v662_v58 = vpop.xlane.xlu0 %661  ;;  %v696_v59 = vsel %vm229_vm2, %v2303_v57, 0.0  ;;  %v833_v12 = vpop.permute.xlu1 %832 }
 0x3c0   :  { %697 = vadd.xlane.f32.xlu0 %v696_v59  ;;  %v670_v9 = vsub.f32 %v638_v36, %v662_v58  ;;  %1794 = vpow2.f32 %v683_v8  ;;  %v838_v30 = vsel %vm740_vm3, %v833_v12, 0 }
 0x3c2   :  { %v685_v10 = vmul.f32 1.442695, %v670_v9 }
 0x3c3   :  { %v785_v60 = vpop.permute.xlu0 %784  ;;  %v881_v13 = vpop.permute.xlu1 %880 }
 0x3c4   :  { %v790_v61 = vsel %vm740_vm3, %v785_v60, 0  ;;  %1796 = vpow2.f32 %v685_v10  ;;  %v886_v38 = vsel %vm740_vm3, %v881_v13, 0 }
 0x3c5   :  { %1685 = vmatpush3.bf16.msra.mxu0 %v790_v61 }
 0x3c6   :  { %1696 = vmatprep.subr.bf16.mxu0 %v1996_v0 }
 0x3cd   :  { %976 = vrot.lane.b32.xlu1 %v2203_v22, %s2002_s3  ;;  %v2315_v22 = vpop.eup %1790 }
 0x3ce   :  { %v699_v11 = vsel %vm229_vm2, %v2315_v22, 0.0 }
 0x3d6   :  { %928 = vrot.lane.b32.xlu0 %v2205_v23, %s2002_s3  ;;  %v2317_v23 = vpop.eup %1792 }
 0x3d7   :  { %v2321_v14 = vpop.eup %1794  ;;  %v702_v18 = vsel %vm229_vm2, %v2317_v23, 0.0 }
 0x3d8   :  { %v705_v17 = vsel %vm229_vm2, %v2321_v14, 0.0  ;;  %v2327_v21 = vpop.eup %1796 }
 0x3d9   :  { %v708_v24 = vsel %vm229_vm2, %v2327_v21, 0.0 }
 0x3f1   :  { %700 = vadd.xlane.f32.xlu1 %v699_v11 }
 0x3f4   :  { %v689_v15 = vpop.xlane.xlu1 %688 }
 0x3f5   :  { %1798 = vrcp.f32 %v689_v15  ;;  %706 = vadd.xlane.f32.xlu1 %v705_v17  ;;  %703 = vadd.xlane.f32.xlu0 %v702_v18 }
 0x3f9   :  { %709 = vadd.xlane.f32.xlu0 %v708_v24 }
 0x3ff   :  { %v1799_v25 = vpop.eup %1798 }
 0x400   :  { %v719_v28 = vmul.f32 %v1799_v25, %v2291_v44 }
 0x402   :  { %v727_v29 = vpack.c.bf16 %v719_v28, %v719_v28 }
 0x404   :  { %1681 = vmatmul.mubr.msk.bf16.vlgmr.msra.gmra.mrb[16].mxu1 %vm229_vm2, %v727_v29 }
 0x405   :  { %1691 = vmatpush3.bf16.msra.mxu1 %v838_v30  ;;  %1692 = vmatprep.mubr.msk.bf16.mxu1 %vm1997_vm0, %v1996_v0 }
 0x406   :  { %1072 = vrot.lane.b32.xlu1 %v2211_v27, %s2002_s3  ;;  %1702 = vmatprep.subr.bf16.mxu1 %v1996_v0 }
 0x40f   :  { %1024 = vrot.lane.b32.xlu0 %v2209_v26, %s2002_s3 }
 0x445   :  { %v692_v31 = vpop.xlane.xlu0 %691 }
 0x446   :  { %1800 = vrcp.f32 %v692_v31 }
 0x449   :  { %v695_v32 = vpop.xlane.xlu1 %694 }
 0x44a   :  { %1802 = vrcp.f32 %v695_v32 }
 0x44d   :  { %v698_v33 = vpop.xlane.xlu0 %697  ;;  %v977_v43 = vpop.permute.xlu1 %976 }
 0x44e   :  { %1804 = vrcp.f32 %v698_v33  ;;  %v982_v45 = vsel %vm740_vm3, %v977_v43, 0 }
 0x450   :  { %v1801_v34 = vpop.eup %1800 }
 0x451   :  { %v720_v35 = vmul.f32 %v1801_v34, %v2295_v47  ;;  %v929_v39 = vpop.permute.xlu0 %928 }
 0x452   :  { %v934_v42 = vsel %vm740_vm3, %v929_v39, 0 }
 0x453   :  { %v728_v36 = vpack.c.bf16 %v720_v35, %v720_v35 }
 0x454   :  { %v1803_v37 = vpop.eup %1802 }
 0x455   :  { %v721_v27 = vmul.f32 %v1803_v37, %v2299_v55  ;;  %1687 = vmatmul.mubr.msk.bf16.vlgmr.msra.gmra.mrb[20].mxu0 %vm229_vm2, %v728_v36 }
 0x456   :  { %1697 = vmatpush3.bf16.msra.mxu0 %v886_v38  ;;  %1698 = vmatprep.mubr.msk.bf16.mxu0 %vm1997_vm0, %v1996_v0 }
 0x457   :  { %v729_v26 = vpack.c.bf16 %v721_v27, %v721_v27  ;;  %1708 = vmatprep.subr.bf16.mxu0 %v1996_v0 }
 0x458   :  { %v1805_v40 = vpop.eup %1804 }
 0x459   :  { %v722_v41 = vmul.f32 %v1805_v40, %v2303_v57  ;;  %1693 = vmatmul.mubr.msk.bf16.vlgmr.msra.gmra.mrb[20].mxu1 %vm229_vm2, %v729_v26 }
 0x45a   :  { %1703 = vmatpush3.bf16.msra.mxu1 %v934_v42  ;;  %1704 = vmatprep.mubr.msk.bf16.mxu1 %vm1997_vm0, %v1996_v0 }
 0x45b   :  { %v730_v44 = vpack.c.bf16 %v722_v41, %v722_v41  ;;  %1714 = vmatprep.subr.bf16.mxu1 %v1996_v0 }
 0x45d   :  { %1699 = vmatmul.mubr.msk.bf16.vlgmr.msra.gmra.mrb[24].mxu0 %vm229_vm2, %v730_v44 }
 0x45e   :  { %1709 = vmatpush3.bf16.msra.mxu0 %v982_v45  ;;  %1710 = vmatprep.mubr.msk.bf16.mxu0 %vm1997_vm0, %v1996_v0 }
 0x45f   :  { %1720 = vmatprep.subr.bf16.mxu0 %v1996_v0 }
 0x47e   :  { %v701_v46 = vpop.xlane.xlu1 %700 }
 0x47f   :  { %1806 = vrcp.f32 %v701_v46 }
 0x482   :  { %v707_v48 = vpop.xlane.xlu1 %706  ;;  %v704_v49 = vpop.xlane.xlu0 %703 }
 0x483   :  { %1808 = vrcp.f32 %v707_v48 }
 0x484   :  { %1810 = vrcp.f32 %v704_v49 }
 0x486   :  { %v710_v20 = vpop.xlane.xlu0 %709  ;;  %v1073_v53 = vpop.permute.xlu1 %1072 }
 0x487   :  { %1812 = vrcp.f32 %v710_v20  ;;  %v1078_v59 = vsel %vm740_vm3, %v1073_v53, 0 }
 0x489   :  { %v1807_v50 = vpop.eup %1806 }
 0x48a   :  { %v723_v19 = vmul.f32 %v1807_v50, %v2315_v22  ;;  %v1025_v51 = vpop.permute.xlu0 %1024 }
 0x48b   :  { %v1030_v54 = vsel %vm740_vm3, %v1025_v51, 0 }
 0x48c   :  { %v731_v16 = vpack.c.bf16 %v723_v19, %v723_v19 }
 0x48d   :  { %v1809_v52 = vpop.eup %1808 }
 0x48e   :  { %v1811_v47 = vpop.eup %1810  ;;  %1705 = vmatmul.mubr.msk.bf16.vlgmr.msra.gmra.mrb[24].mxu1 %vm229_vm2, %v731_v16  ;;  %v725_v56 = vmul.f32 %v1809_v52, %v2321_v14 }
 0x48f   :  { %v724_v55 = vmul.f32 %v1811_v47, %v2317_v23  ;;  %1715 = vmatpush3.bf16.msra.mxu1 %v1030_v54  ;;  %1716 = vmatprep.mubr.msk.bf16.mxu1 %vm1997_vm0, %v1996_v0 }
 0x490   :  { %1726 = vmatprep.subr.bf16.mxu1 %v1996_v0  ;;  %v733_v60 = vpack.c.bf16 %v725_v56, %v725_v56 }
 0x491   :  { %v732_v57 = vpack.c.bf16 %v724_v55, %v724_v55  ;;  %v1813_v58 = vpop.eup %1812 }
 0x492   :  { %v726_v61 = vmul.f32 %v1813_v58, %v2327_v21  ;;  %v1774_v58 = vld [vmem:[%s2464_s6] sm:$0xff]  }
 0x493   :  { %1711 = vmatmul.mubr.msk.bf16.vlgmr.msra.gmra.mrb[28].mxu0 %vm229_vm2, %v732_v57 }
 0x494   :  { %1721 = vmatpush3.bf16.msra.mxu0 %v1078_v59  ;;  %1722 = vmatprep.mubr.msk.bf16.mxu0 %vm1997_vm0, %v1996_v0  ;;  %v734_v62 = vpack.c.bf16 %v726_v61, %v726_v61  ;;  %v1775_v59 = vld [vmem:[%s2464_s6 + $0x8] sm:$0xff]  }
 0x495   :  { %1734 = vmatprep.subr.bf16.mxu0 %v1996_v0 }
 0x496   :  { %1717 = vmatmul.mubr.msk.bf16.vlgmr.msra.gmra.mrb[28].mxu1 %vm229_vm2, %v733_v60 }
 0x497   :  { %1730 = vmatprep.mubr.msk.bf16.mxu1 %vm1997_vm0, %v1996_v0  ;;  %1727 = vmatpush3.bf16.msra.mxu1 %v1774_v58  ;;  %v1564_v58 = vld [vmem:[%s2469_s11] ss:$0 sm:$0xff] }
 0x498   :  { %1728 = vmatprep.subr.bf16.mxu1 %v1996_v0 }
 0x49b   :  { %1723 = vmatmul.mubr.msk.bf16.vlgmr.msra.gmra.mrb[32].mxu0 %vm229_vm2, %v734_v62  ;;  %1729 = vmatpush3.bf16.msra.mxu1 %v1775_v59 }
 0x49c   :  { %1738 = vmatprep.mubr.msk.bf16.mxu0 %vm1997_vm0, %v1996_v0  ;;  %1742 = vmatprep.subr.bf16.mxu1 %v1996_v0 }
 0x4d7   :  { %v778_v63 = vpop.f32.mrb[16].mxu1 }
 0x4d8   :  { %v1682_v1 = vpop.f32.mrb[17].mxu1 }
 0x4d9   :  { %v781_v2 = vpop.f32.mrb[18].mxu1 }
 0x4da   :  { %v1683_v5 = vpop.f32.mrb[19].mxu1 }
 0x528   :  { %v826_v6 = vpop.f32.mrb[20].mxu0 }
 0x529   :  { %1122 = vrot.lane.b32.xlu0 %v826_v6, %s2003_s1  ;;  %v1688_v7 = vpop.f32.mrb[21].mxu0 }
 0x52a   :  { %v829_v8 = vpop.f32.mrb[22].mxu0  ;;  %v1556_v7 = vld [vmem:[#allocation5] ss:$0 sm:$0xff] }
 0x52b   :  { %v1689_v9 = vpop.f32.mrb[23].mxu0 }
 0x52c   :  { %v874_v10 = vpop.f32.mrb[20].mxu1 }
 0x52d   :  { %v1694_v12 = vpop.f32.mrb[21].mxu1  ;;  %1130 = vrot.lane.b32.xlu0 %v874_v10, %s2004_s0 }
 0x52e   :  { %v877_v22 = vpop.f32.mrb[22].mxu1  ;;  %v1557_v12 = vld [vmem:[#allocation7] ss:$0 sm:$0xff] }
 0x52f   :  { %v1695_v23 = vpop.f32.mrb[23].mxu1 }
 0x530   :  { %v922_v13 = vpop.f32.mrb[24].mxu0 }
 0x531   :  { %1138 = vrot.lane.b32.xlu0 %v922_v13, %s2005_s4  ;;  %v1700_v11 = vpop.f32.mrb[25].mxu0 }
 0x532   :  { %v925_v14 = vpop.f32.mrb[26].mxu0 }
 0x533   :  { %v1701_v15 = vpop.f32.mrb[27].mxu0  ;;  %v1558_v14 = vld [vmem:[#allocation8] ss:$0 sm:$0xff] }
 0x561   :  { %v970_v17 = vpop.f32.mrb[24].mxu1 }
 0x562   :  { %v1706_v18 = vpop.f32.mrb[25].mxu1 }
 0x563   :  { %v973_v21 = vpop.f32.mrb[26].mxu1 }
 0x564   :  { %v1707_v24 = vpop.f32.mrb[27].mxu1 }
 0x566   :  { %v1018_v25 = vpop.f32.mrb[28].mxu0 }
 0x567   :  { %1124 = vrot.lane.b32.xlu1 %v1018_v25, %s2003_s1  ;;  %v1712_v28 = vpop.f32.mrb[29].mxu0 }
 0x568   :  { %v1021_v29 = vpop.f32.mrb[30].mxu0 }
 0x569   :  { %v1713_v30 = vpop.f32.mrb[31].mxu0  ;;  %v1066_v31 = vpop.f32.mrb[28].mxu1 }
 0x56a   :  { %v1718_v32 = vpop.f32.mrb[29].mxu1 }
 0x56b   :  { %1132 = vrot.lane.b32.xlu1 %v1066_v31, %s2004_s0  ;;  %v1069_v33 = vpop.f32.mrb[30].mxu1  ;;  %s1519_s0 = sshll.u32 %s2006_s30, 4  ;;  %s1520_s0 = int_to_ptr.vmem [resolvable:$true] %s1519_s0 }
 0x56c   :  { %v1719_v34 = vpop.f32.mrb[31].mxu1  ;;  %p1963_p7 = scmp.lt.s32.totalorder %s1520_s0, %s1520_s0 }
 0x56e   :  { %v1114_v35 = vpop.f32.mrb[32].mxu0 }
 0x56f   :  { %1140 = vrot.lane.b32.xlu1 %v1114_v35, %s2005_s4  ;;  %v1724_v36 = vpop.f32.mrb[33].mxu0  ;;  %s1958_s4 = scalar_lea.vmem %s1520_s0, 256 }
 0x570   :  { %v1117_v37 = vpop.f32.mrb[34].mxu0  ;;  %p1959_p6 = scmp.ne.s32.totalorder %s1520_s0, %s1958_s4  ;;  %p1964_p8 = scmp.lt.s32.totalorder %s1958_s4, %s1958_s4 }
 0x571   :  { %v1725_v38 = vpop.f32.mrb[35].mxu0 }
 0x572   :  { %p1965_p9 = por %p1964_p8, %p1963_p7 }
 0x574   :  { %p1966_p10 = pnand %p1965_p9, %p1959_p6 }
 0x59b   :  { %v1123_v27 = vpop.permute.xlu0 %1122 }
 0x59c   :  { %v1144_v26 = vsel %vm229_vm2, %v778_v63, %v1123_v27 }
 0x59f   :  { %v1131_v39 = vpop.permute.xlu0 %1130 }
 0x5a0   :  { %v1147_v40 = vsel %vm1146_vm4, %v1144_v26, %v1131_v39  ;;  %v1777_v26 = vld [vmem:[%s2468_s10 + $0x8] sm:$0xff]  }
 0x5a3   :  { %v1139_v41 = vpop.permute.xlu0 %1138 }
 0x5a4   :  { %v1150_v42 = vsel %vm1149_vm5, %v1147_v40, %v1139_v41  ;;  %v1778_v40 = vld [vmem:[%s2470_s12] sm:$0xff]   ;;  %v1779_v41 = vld [vmem:[%s2470_s12 + $0x8] sm:$0xff]  }
 0x5a5   :  { %v1154_v43 = vsel %vm153_vm1, %v1150_v42, 0.0 }
 0x5a6   :  { %1155 = vadd.xlane.f32.xlu0 %v1154_v43 }
 0x5d9   :  { %v1125_v44 = vpop.permute.xlu1 %1124 }
 0x5da   :  { %v1145_v46 = vsel %vm229_vm2, %v970_v17, %v1125_v44 }
 0x5dd   :  { %v1133_v45 = vpop.permute.xlu1 %1132 }
 0x5de   :  { %v1148_v48 = vsel %vm1146_vm4, %v1145_v46, %v1133_v45 }
 0x5e1   :  { %v1141_v49 = vpop.permute.xlu1 %1140 }
 0x5e2   :  { %v1151_v20 = vsel %vm1149_vm5, %v1148_v48, %v1141_v49 }
 0x5e3   :  { %v1157_v50 = vsel %vm153_vm1, %v1151_v20, 0.0 }
 0x5e4   :  { %1158 = vadd.xlane.f32.xlu1 %v1157_v50 }
 0x633   :  { %v1156_v19 = vpop.xlane.xlu0 %1155 }
 0x634   :  { %v1161_v51 = vmul.f32 0.03125, %v1156_v19 }
 0x636   :  { %v1163_v16 = vsub.f32 %v1150_v42, %v1161_v51 }
 0x638   :  { %v1165_v52 = vmul.f32 %v1163_v16, %v1163_v16 }
 0x63a   :  { %v1167_v47 = vsel %vm153_vm1, %v1165_v52, 0.0  ;;  %v1563_v52 = vld [vmem:[#allocation11] ss:$0 sm:$0xff] }
 0x63b   :  { %1168 = vadd.xlane.f32.xlu0 %v1167_v47 }
 0x671   :  { %v1159_v54 = vpop.xlane.xlu1 %1158 }
 0x672   :  { %v1162_v55 = vmul.f32 0.03125, %v1159_v54 }
 0x674   :  { %v1164_v56 = vsub.f32 %v1151_v20, %v1162_v55  ;;  %v1562_v20 = vld [vmem:[#allocation10] ss:$0 sm:$0xff] }
 0x676   :  { %v1166_v53 = vmul.f32 %v1164_v56, %v1164_v56 }
 0x678   :  { %v1170_v57 = vsel %vm153_vm1, %v1166_v53, 0.0  ;;  %v1780_v53 = vld [vmem:[%s2470_s12 + $0x10] sm:$0xff]  }
 0x679   :  { %1171 = vadd.xlane.f32.xlu0 %v1170_v57  ;;  %v1781_v57 = vld [vmem:[%s2470_s12 + $0x18] sm:$0xff]  }
 0x6c8   :  { %v1169_v60 = vpop.xlane.xlu0 %1168 }
 0x6c9   :  { %v1173_v61 = vmul.f32 0.03125, %v1169_v60 }
 0x6cb   :  { %v1175_v62 = vadd.f32 1e-05, %v1173_v61 }
 0x6cd   :  { %1814 = vrsqrt.f32 %v1175_v62 }
 0x6d7   :  { %v1815_v5 = vpop.eup %1814 }
 0x6d8   :  { %v1179_v6 = vmul.f32 %v1815_v5, %v1163_v16 }
 0x6da   :  { %v1187_v9 = vmul.f32 %v1556_v7, %v1179_v6 }
 0x6dc   :  { %v1195_v23 = vadd.f32 %v1557_v12, %v1187_v9 }
 0x706   :  { %v1172_v63 = vpop.xlane.xlu0 %1171 }
 0x707   :  { %v1174_v1 = vmul.f32 0.03125, %v1172_v63 }
 0x709   :  { %v1176_v2 = vadd.f32 1e-05, %v1174_v1 }
 0x70b   :  { %1816 = vrsqrt.f32 %v1176_v2 }
 0x715   :  { %v1817_v8 = vpop.eup %1816 }
 0x716   :  { %v1180_v10 = vmul.f32 %v1817_v8, %v1164_v56 }
 0x718   :  { %v1188_v22 = vmul.f32 %v1556_v7, %v1180_v10 }
 0x71a   :  { %v1196_v13 = vadd.f32 %v1557_v12, %v1188_v22 }
 0x71c   :  { %v1197_v11 = vpack.c.bf16 %v1196_v13, %v1195_v23 }
 0x71e   :  { %1731 = vmatmul.mubr.msk.bf16.vlgmr.msra.gmra.mrb[32].mxu1 %vm153_vm1, %v1197_v11 }
 0x71f   :  { %1750 = vmatprep.mubr.msk.bf16.mxu1 %vm1997_vm0, %v1996_v0  ;;  %1743 = vmatpush3.bf16.msra.mxu1 %v1778_v40 }
 0x720   :  { %1744 = vmatprep.subr.bf16.mxu1 %v1996_v0 }
 0x723   :  { %1745 = vmatpush3.bf16.msra.mxu1 %v1779_v41 }
 0x724   :  { %1746 = vmatprep.subr.bf16.mxu1 %v1996_v0 }
 0x727   :  { %1747 = vmatpush3.bf16.msra.mxu1 %v1780_v53 }
 0x728   :  { %1748 = vmatprep.subr.bf16.mxu1 %v1996_v0 }
 0x72b   :  { %1749 = vmatpush3.bf16.msra.mxu1 %v1781_v57 }
 0x7f1   :  { %v1258_v15 = vpop.f32.mrb[32].mxu1 }
 0x7f2   :  { %v1259_v17 = vadd.f32 %v1558_v14, %v1258_v15  ;;  %v1732_v18 = vpop.f32.mrb[33].mxu1 }
 0x7f3   :  { %v1261_v21 = vpop.f32.mrb[34].mxu1 }
 0x7f4   :  { %v1262_v24 = vadd.f32 %v1558_v14, %v1261_v21  ;;  %v1733_v25 = vpop.f32.mrb[35].mxu1  ;;  %v1265_v28 = vadd.f32 %v1259_v17, %v2180_v3 }
 0x7f6   :  { %v1269_v29 = vsel %vm153_vm1, %v1265_v28, 0.0  ;;  %v1266_v30 = vadd.f32 %v1262_v24, %v2185_v4  ;;  %v1776_v4 = vld [vmem:[%s2468_s10] sm:$0xff]  }
 0x7f7   :  { %1270 = vadd.xlane.f32.xlu1 %v1269_v29  ;;  %1735 = vmatpush3.bf16.msra.mxu0 %v1776_v4  ;;  %v1575_v4 = vld [vmem:[%s2473_s15] ss:$0 sm:$0xff] }
 0x7f8   :  { %v1272_v31 = vsel %vm153_vm1, %v1266_v30, 0.0  ;;  %1736 = vmatprep.subr.bf16.mxu0 %v1996_v0  ;;  %v1568_v0 = vld [vmem:[%s2471_s13] ss:$0 sm:$0xff] }
 0x7f9   :  { %1273 = vadd.xlane.f32.xlu0 %v1272_v31 }
 0x7fb   :  { %1737 = vmatpush3.bf16.msra.mxu0 %v1777_v26 }
 0x884   :  { %v1271_v32 = vpop.xlane.xlu1 %1270 }
 0x885   :  { %v1275_v33 = vmul.f32 0.03125, %v1271_v32 }
 0x886   :  { %v1274_v34 = vpop.xlane.xlu0 %1273 }
 0x887   :  { %v1277_v35 = vsub.f32 %v1265_v28, %v1275_v33  ;;  %v1276_v36 = vmul.f32 0.03125, %v1274_v34 }
 0x889   :  { %v1278_v37 = vsub.f32 %v1266_v30, %v1276_v36  ;;  %v1279_v38 = vmul.f32 %v1277_v35, %v1277_v35 }
 0x88b   :  { %v1281_v27 = vsel %vm153_vm1, %v1279_v38, 0.0  ;;  %v1280_v39 = vmul.f32 %v1278_v37, %v1278_v37 }
 0x88c   :  { %1282 = vadd.xlane.f32.xlu1 %v1281_v27  ;;  %v1574_v27 = vld [vmem:[%s2472_s14] ss:$0 sm:$0xff] }
 0x88d   :  { %v1284_v3 = vsel %vm153_vm1, %v1280_v39, 0.0 }
 0x88e   :  { %1285 = vadd.xlane.f32.xlu0 %v1284_v3 }
 0x919   :  { %v1283_v42 = vpop.xlane.xlu1 %1282 }
 0x91a   :  { %v1287_v43 = vmul.f32 0.03125, %v1283_v42 }
 0x91b   :  { %v1286_v44 = vpop.xlane.xlu0 %1285 }
 0x91c   :  { %v1289_v45 = vadd.f32 1e-05, %v1287_v43  ;;  %v1288_v46 = vmul.f32 0.03125, %v1286_v44 }
 0x91e   :  { %1818 = vrsqrt.f32 %v1289_v45  ;;  %v1290_v48 = vadd.f32 1e-05, %v1288_v46 }
 0x920   :  { %1820 = vrsqrt.f32 %v1290_v48 }
 0x928   :  { %v1819_v49 = vpop.eup %1818 }
 0x929   :  { %v1293_v50 = vmul.f32 %v1819_v49, %v1277_v35 }
 0x92a   :  { %v1821_v19 = vpop.eup %1820 }
 0x92b   :  { %v1301_v51 = vmul.f32 %v1562_v20, %v1293_v50  ;;  %v1294_v16 = vmul.f32 %v1821_v19, %v1278_v37 }
 0x92d   :  { %v1302_v47 = vmul.f32 %v1562_v20, %v1294_v16  ;;  %v1309_v54 = vadd.f32 %v1563_v52, %v1301_v51 }
 0x92f   :  { %v1310_v55 = vadd.f32 %v1563_v52, %v1302_v47 }
 0x931   :  { %v1311_v56 = vpack.c.bf16 %v1310_v55, %v1309_v54 }
 0x933   :  { %1739 = vmatmul.mubr.msk.bf16.vlgmr.msra.gmra.mrb[36].mxu0 %vm153_vm1, %v1311_v56 }
 0xa06   :  { %v1372_v59 = vpop.f32.mrb[36].mxu0 }
 0xa07   :  { %v1373_v60 = vadd.f32 %v1564_v58, %v1372_v59  ;;  %v1740_v61 = vpop.f32.mrb[37].mxu0 }
 0xa08   :  { %v1375_v62 = vpop.f32.mrb[38].mxu0 }
 0xa09   :  { %v1376_v63 = vadd.f32 %v1564_v58, %v1375_v62  ;;  %v1741_v1 = vpop.f32.mrb[39].mxu0  ;;  %v1379_v2 = vmax.f32 %v1373_v60, 0.0 }
 0xa0b   :  { %v1380_v5 = vmax.f32 %v1376_v63, 0.0 }
 0xa0d   :  { %v1381_v6 = vpack.c.bf16 %v1380_v5, %v1379_v2 }
 0xa0f   :  { %1751 = vmatmul.mubr.msk.bf16.vlgmr.msra.gmra.mrb[36].mxu1 %vm1421_vm6, %v1381_v6 }
 0xae2   :  { %v1459_v7 = vpop.f32.mrb[36].mxu1 }
 0xae3   :  { %v1460_v8 = vadd.f32 %v1568_v0, %v1459_v7  ;;  %v1752_v9 = vpop.f32.mrb[37].mxu1 }
 0xae4   :  { %v1462_v10 = vpop.f32.mrb[38].mxu1 }
 0xae5   :  { %v1463_v12 = vadd.f32 %v1568_v0, %v1462_v10  ;;  %v1753_v22 = vpop.f32.mrb[39].mxu1  ;;  %v1466_v23 = vadd.f32 %v1460_v8, %v1309_v54 }
 0xae7   :  { %v1470_v13 = vsel %vm153_vm1, %v1466_v23, 0.0  ;;  %v1467_v11 = vadd.f32 %v1463_v12, %v1310_v55 }
 0xae8   :  { %1471 = vadd.xlane.f32.xlu1 %v1470_v13 }
 0xae9   :  { %v1473_v14 = vsel %vm153_vm1, %v1467_v11, 0.0 }
 0xaea   :  { %1474 = vadd.xlane.f32.xlu0 %v1473_v14 }
 0xb75   :  { %v1472_v15 = vpop.xlane.xlu1 %1471 }
 0xb76   :  { %v1476_v17 = vmul.f32 0.03125, %v1472_v15 }
 0xb77   :  { %v1475_v18 = vpop.xlane.xlu0 %1474 }
 0xb78   :  { %v1478_v21 = vsub.f32 %v1466_v23, %v1476_v17  ;;  %v1477_v24 = vmul.f32 0.03125, %v1475_v18 }
 0xb7a   :  { %v1479_v25 = vsub.f32 %v1467_v11, %v1477_v24  ;;  %v1480_v28 = vmul.f32 %v1478_v21, %v1478_v21 }
 0xb7c   :  { %v1482_v29 = vsel %vm153_vm1, %v1480_v28, 0.0  ;;  %v1481_v30 = vmul.f32 %v1479_v25, %v1479_v25 }
 0xb7d   :  { %1483 = vadd.xlane.f32.xlu1 %v1482_v29 }
 0xb7e   :  { %v1485_v31 = vsel %vm153_vm1, %v1481_v30, 0.0 }
 0xb7f   :  { %1486 = vadd.xlane.f32.xlu0 %v1485_v31 }
 0xc0a   :  { %v1484_v32 = vpop.xlane.xlu1 %1483 }
 0xc0b   :  { %v1488_v33 = vmul.f32 0.03125, %v1484_v32 }
 0xc0c   :  { %v1487_v34 = vpop.xlane.xlu0 %1486 }
 0xc0d   :  { %v1490_v35 = vadd.f32 1e-05, %v1488_v33  ;;  %v1489_v36 = vmul.f32 0.03125, %v1487_v34 }
 0xc0f   :  { %1822 = vrsqrt.f32 %v1490_v35  ;;  %v1491_v37 = vadd.f32 1e-05, %v1489_v36 }
 0xc11   :  { %1824 = vrsqrt.f32 %v1491_v37 }
 0xc19   :  { %v1823_v38 = vpop.eup %1822 }
 0xc1a   :  { %v1494_v39 = vmul.f32 %v1823_v38, %v1478_v21 }
 0xc1b   :  { %v1825_v3 = vpop.eup %1824 }
 0xc1c   :  { %v1502_v26 = vmul.f32 %v1574_v27, %v1494_v39  ;;  %v1495_v40 = vmul.f32 %v1825_v3, %v1479_v25 }
 0xc1e   :  { %v1503_v41 = vmul.f32 %v1574_v27, %v1495_v40  ;;  %v1510_v42 = vadd.f32 %v1575_v4, %v1502_v26 }
 0xc20   :  { %v1511_v43 = vadd.f32 %v1575_v4, %v1503_v41  ;;  %1512 = vst.msk [vmem:[#allocation13] sm:$0xff] %vm153_vm1, %v1510_v42 }
 0xc22   :  { %1513 = vst.msk [vmem:[#allocation13 + $0x8] sm:$0xff] %vm153_vm1, %v1511_v43 }
 0xc23   :  { %1969 = shalt.err (!%p1966_p10)
}
 0xc24   :  { %s1970_s8 = scalar_lea.hbm %s2474_s16, 256 }
 0xc25   :  { %p1971_p11 = scmp.ne.s32.totalorder %s2474_s16, %s1970_s8  ;;  %p1974_p12 = scmp.lt.u32.totalorder %s1970_s8, %s2474_s16 }
 0xc27   :  { %p1976_p13 = pnand %p1974_p12, %p1971_p11 }
 0xc29   :  { %1979 = shalt.err (!%p1976_p13)
}
 0xc2a   :  { %s2007_s22 = smov 128  }
 0xc2b   :  { %1525 = dma.vmem_to_hbm [thread:$0]  %s1520_s0, 256, %s2474_s16, [#allocation4], %s2007_s22, %s2007_s22, %s2003_s1  }
 0xc2c   :  { %1988 = dma.done.wait [#allocation4], 256  }
 0xc2d   :  { %1989 = vsyncadd [#allocation4], 4294967040 }
 0xc2e   :  { %1529 = vsyncpa [#allocation3], 1 }
 0xc2f   :  { %1530 = vsyncpa [#allocation6], 1 }
 0xc30   :  { %1531 = vsyncpa [#allocation9], 1 }
 0xc31   :  { %1532 = vsyncpa [#allocation12], 1 }
 0xc32   :  { %1533 = vsyncpa [#allocation4], 1 }

</bundles_post_ra>
